<compile_context>
chip_gen: v5e
topology: v5e:2x2
jax: 0.10.0
libtpu: 0.0.40
codegen_flags: <defaults>
</compile_context>

<pallas_src>
import jax
import jax.numpy as jnp
import numpy as np
from jax import lax
from jax.experimental import pallas as pl
from jax.experimental.pallas import tpu as pltpu


def _hswish(v):
    return v * jnp.clip(v + 3.0, 0.0, 6.0) / 6.0


def _hsigmoid(v):
    return jnp.clip(v + 3.0, 0.0, 6.0) / 6.0


def prepare_params(raw_params, H, W):
    """Fold BN scales into conv weights and lay everything out for the kernel."""
    (w_pw1, s1, sh1, w_dw, s2, sh2, w_se1, w_se2, w_pw2, s3, sh3) = raw_params
    Cin, E = w_pw1.shape
    Cout = w_pw2.shape[1]

    w1 = (w_pw1.T * s1[:, None]).astype(jnp.bfloat16)       # (E, Cin), BN1 scale folded
    b1 = sh1.reshape(E, 1).astype(jnp.float32)
    wdw = (w_dw.T * s2[:, None]).astype(jnp.float32)        # (E, 9),  BN2 scale folded
    b2 = sh2.reshape(E, 1).astype(jnp.float32)
    wse1t = w_se1.T.astype(jnp.float32)                     # (E//4, E)
    wse2t = w_se2.T.astype(jnp.float32)                     # (E, E//4)
    w2 = (w_pw2.T * s3[:, None]).astype(jnp.bfloat16)       # (Cout, E), BN3 scale folded
    b3 = sh3.reshape(Cout, 1).astype(jnp.float32)

    # Per-tap validity masks for the zero-padded 3x3 depthwise conv, (9, H*W).
    hh, ww = jnp.meshgrid(jnp.arange(H), jnp.arange(W), indexing="ij")
    rows = []
    for dy in (-1, 0, 1):
        for dx in (-1, 0, 1):
            valid = ((hh + dy >= 0) & (hh + dy < H) &
                     (ww + dx >= 0) & (ww + dx < W))
            rows.append(valid.reshape(-1).astype(jnp.float32))
    mask = jnp.stack(rows)                                   # (9, H*W)

    return (w1, b1, wdw, b2, mask, wse1t, wse2t, w2, b3)


def bottleneck_forward(x_nchw, params):
    """x_nchw: (N, Cin, H, W) float32. Returns (N, Cout, H, W)."""
    (w1, b1, wdw, b2, mask, wse1t, wse2t, w2, b3) = params
    N, Cin, H, W = x_nchw.shape
    HW = H * W
    E = w1.shape[0]
    Cout = w2.shape[0]

    x = x_nchw.reshape(N, Cin, HW)        # channels on sublanes, spatial on lanes

    def kernel(x_ref, w1_ref, b1_ref, wdw_ref, b2_ref, mask_ref,
               wse1_ref, wse2_ref, w2_ref, b3_ref, o_ref):
        x_f32 = x_ref[0]                                       # (Cin, HW) f32

        # ---- conv1: 1x1 pointwise (BN1 scale folded) -> shift -> h_swish ----
        out1 = jnp.dot(w1_ref[...], x_f32.astype(jnp.bfloat16),
                       preferred_element_type=jnp.float32)     # (E, HW)
        out1 = _hswish(out1 + b1_ref[...])

        # ---- conv2 depthwise 3x3 (pad=1, stride=1): lane rolls + masks ------
        acc = out1 * wdw_ref[:, 4:5]                           # center tap (no mask)
        tap = 0
        for dy in (-1, 0, 1):
            for dx in (-1, 0, 1):
                if dy == 0 and dx == 0:
                    tap += 1
                    continue
                shift = (-(dy * W + dx)) % HW                  # value[i] <- out1[i + dy*W + dx]
                v = pltpu.roll(out1, shift, axis=1)
                acc = acc + (v * mask_ref[tap:tap + 1, :]) * wdw_ref[:, tap:tap + 1]
                tap += 1
        out2 = acc + b2_ref[...]                               # firstBN shift

        # ---- SE: avg pool (lane reduce) -> fc -> ReLU -> fc -> h_sigmoid ----
        y = jnp.mean(out2, axis=1, keepdims=True)              # (E, 1)
        h = jnp.maximum(jnp.dot(wse1_ref[...], y,
                                preferred_element_type=jnp.float32), 0.0)
        s = _hsigmoid(jnp.dot(wse2_ref[...], h,
                              preferred_element_type=jnp.float32))  # (E, 1)
        out2 = _hswish(out2 * s)

        # ---- conv2 tail: 1x1 pointwise (BN3 scale folded) -> shift -> resid --
        out3 = jnp.dot(w2_ref[...], out2.astype(jnp.bfloat16),
                       preferred_element_type=jnp.float32)     # (Cout, HW)
        o_ref[0] = (out3 + b3_ref[...] + x_f32).astype(o_ref.dtype)

    def full_spec(a):
        nd = a.ndim
        return pl.BlockSpec(a.shape, lambda b, _nd=nd: (0,) * _nd)

    out = pl.pallas_call(
        kernel,
        out_shape=jax.ShapeDtypeStruct((N, Cout, HW), x_nchw.dtype),
        grid_spec=pltpu.PrefetchScalarGridSpec(
            num_scalar_prefetch=0,
            grid=(N,),
            in_specs=[pl.BlockSpec((1, Cin, HW), lambda b: (b, 0, 0)),
                      full_spec(w1), full_spec(b1),
                      full_spec(wdw), full_spec(b2), full_spec(mask),
                      full_spec(wse1t), full_spec(wse2t),
                      full_spec(w2), full_spec(b3)],
            out_specs=pl.BlockSpec((1, Cout, HW), lambda b: (b, 0, 0)),
        ),
        compiler_params=pltpu.CompilerParams(
            dimension_semantics=("parallel",)),
    )(x, w1, b1, wdw, b2, mask, wse1t, wse2t, w2, b3)

    return out.reshape(N, Cout, H, W)


def bottleneck_reference(x_nchw, raw_params, matmul_dtype=jnp.float32):
    """Pure-JAX (lax conv) reference.  matmul_dtype=bfloat16 mirrors the
    kernel's MXU input precision (f32 accumulation) so the comparison is tight;
    all other math is f32, identical to the original module semantics."""
    (w_pw1, s1, sh1, w_dw, s2, sh2, w_se1, w_se2, w_pw2, s3, sh3) = raw_params
    x = jnp.transpose(x_nchw, (0, 2, 3, 1))                    # NHWC
    Cin = x.shape[-1]
    E = w_pw1.shape[1]
    Cout = w_pw2.shape[1]
    dn = ("NHWC", "HWIO", "NHWC")

    w1 = (w_pw1 * s1[None, :]).astype(matmul_dtype).reshape(1, 1, Cin, E)
    out1 = lax.conv_general_dilated(x.astype(matmul_dtype), w1, (1, 1), "VALID",
                                    dimension_numbers=dn,
                                    preferred_element_type=jnp.float32)
    out1 = _hswish(out1 + sh1.reshape(1, 1, 1, E))

    wdw = (w_dw * s2[None, :]).reshape(3, 3, 1, E)
    out2 = lax.conv_general_dilated(out1, wdw, (1, 1), "SAME",
                                    dimension_numbers=dn, feature_group_count=E,
                                    preferred_element_type=jnp.float32)
    out2 = out2 + sh2.reshape(1, 1, 1, E)

    y = jnp.mean(out2, axis=(1, 2))                            # (N, E)
    y = jnp.maximum(y @ w_se1, 0.0)
    y = _hsigmoid(y @ w_se2)
    out2 = _hswish(out2 * y[:, None, None, :])

    w2 = (w_pw2 * s3[None, :]).astype(matmul_dtype).reshape(1, 1, E, Cout)
    out3 = lax.conv_general_dilated(out2.astype(matmul_dtype), w2, (1, 1), "VALID",
                                    dimension_numbers=dn,
                                    preferred_element_type=jnp.float32)
    out3 = out3 + sh3.reshape(1, 1, 1, Cout)
    return jnp.transpose(out3 + x, (0, 3, 1, 2))


if __name__ == "__main__":
    N, Cin, H, W = 2, 16, 16, 16
    E, Cout, red = 32, 16, 4        # exp_size, out_channels, SE reduction_ratio

    keys = jax.random.split(jax.random.PRNGKey(0), 18)

    def make_bn(kg, kb, km, kv, C):
        gamma = 1.0 + 0.1 * jax.random.normal(kg, (C,), jnp.float32)
        beta = 0.1 * jax.random.normal(kb, (C,), jnp.float32)
        mean = 0.1 * jax.random.normal(km, (C,), jnp.float32)
        var = jnp.abs(jax.random.normal(kv, (C,), jnp.float32)) + 0.5
        scale = gamma / jnp.sqrt(var + 1e-5)
        shift = beta - mean * scale
        return scale, shift

    x = jax.random.normal(keys[0], (N, Cin, H, W), jnp.float32)

    w_pw1 = jax.random.normal(keys[1], (Cin, E), jnp.float32) / np.sqrt(Cin)
    s1, sh1 = make_bn(keys[2], keys[3], keys[4], keys[5], E)
    w_dw = jax.random.normal(keys[6], (9, E), jnp.float32) / 3.0
    s2, sh2 = make_bn(keys[7], keys[8], keys[9], keys[10], E)
    w_se1 = jax.random.normal(keys[11], (E, E // red), jnp.float32) / np.sqrt(E)
    w_se2 = jax.random.normal(keys[12], (E // red, E), jnp.float32) / np.sqrt(E // red)
    w_pw2 = jax.random.normal(keys[13], (E, Cout), jnp.float32) / np.sqrt(E)
    s3, sh3 = make_bn(keys[14], keys[15], keys[16], keys[17], Cout)

    raw_params = (w_pw1, s1, sh1, w_dw, s2, sh2,
                  w_se1, w_se2, w_pw2, s3, sh3)
    params = prepare_params(raw_params, H, W)

    out = jax.block_until_ready(bottleneck_forward(x, params))
    # Reference with the same bf16-operand / f32-accumulate pointwise matmuls
    # so the tolerance can stay tight; structure (convs/SE/activations/residual)
    # is the unmodified module graph in pure lax.
    ref = jax.block_until_ready(
        bottleneck_reference(x, raw_params, matmul_dtype=jnp.bfloat16))

    assert out.shape == (N, Cout, H, W)
    np.testing.assert_allclose(np.asarray(out), np.asarray(ref),
                               atol=2e-3, rtol=2e-3)
    print("KERNEL_OK")
</pallas_src>

<mosaic_0001>
module attributes {stable_mosaic.version = 11 : i64} {
  func.func @kernel(%arg0: i32, %arg1: memref<1x16x256xf32, #tpu.memory_space<vmem>>, %arg2: memref<32x16xbf16, #tpu.memory_space<vmem>>, %arg3: memref<32x1xf32, #tpu.memory_space<vmem>>, %arg4: memref<32x9xf32, #tpu.memory_space<vmem>>, %arg5: memref<32x1xf32, #tpu.memory_space<vmem>>, %arg6: memref<9x256xf32, #tpu.memory_space<vmem>>, %arg7: memref<8x32xf32, #tpu.memory_space<vmem>>, %arg8: memref<32x8xf32, #tpu.memory_space<vmem>>, %arg9: memref<16x32xbf16, #tpu.memory_space<vmem>>, %arg10: memref<16x1xf32, #tpu.memory_space<vmem>>, %arg11: memref<1x16x256xf32, #tpu.memory_space<vmem>>) attributes {dimension_semantics = [#tpu.dimension_semantics<parallel>], iteration_bounds = array<i64: 2>, scalar_prefetch = 0 : i64, scratch_operands = 0 : i64, tpu.core_type = #tpu.core_type<tc>, window_params = [{transform_indices = @transform_0, window_bounds = array<i64: 1, 16, 256>}, {pipeline_mode = #tpu.pipeline_mode<synchronous>, transform_indices = @transform_1, window_bounds = array<i64: 32, 16>}, {pipeline_mode = #tpu.pipeline_mode<synchronous>, transform_indices = @transform_2, window_bounds = array<i64: 32, 1>}, {pipeline_mode = #tpu.pipeline_mode<synchronous>, transform_indices = @transform_3, window_bounds = array<i64: 32, 9>}, {pipeline_mode = #tpu.pipeline_mode<synchronous>, transform_indices = @transform_4, window_bounds = array<i64: 32, 1>}, {pipeline_mode = #tpu.pipeline_mode<synchronous>, transform_indices = @transform_5, window_bounds = array<i64: 9, 256>}, {pipeline_mode = #tpu.pipeline_mode<synchronous>, transform_indices = @transform_6, window_bounds = array<i64: 8, 32>}, {pipeline_mode = #tpu.pipeline_mode<synchronous>, transform_indices = @transform_7, window_bounds = array<i64: 32, 8>}, {pipeline_mode = #tpu.pipeline_mode<synchronous>, transform_indices = @transform_8, window_bounds = array<i64: 16, 32>}, {pipeline_mode = #tpu.pipeline_mode<synchronous>, transform_indices = @transform_9, window_bounds = array<i64: 16, 1>}, {transform_indices = @transform_10, window_bounds = array<i64: 1, 16, 256>}]} {
    %c0 = arith.constant 0 : index
    %c0_0 = arith.constant 0 : index
    %c0_1 = arith.constant 0 : index
    %0 = vector.load %arg1[%c0, %c0_0, %c0_1] : memref<1x16x256xf32, #tpu.memory_space<vmem>>, vector<1x16x256xf32>
    %1 = vector.shape_cast %0 : vector<1x16x256xf32> to vector<16x256xf32>
    %c0_2 = arith.constant 0 : index
    %c0_3 = arith.constant 0 : index
    %2 = vector.load %arg2[%c0_2, %c0_3] : memref<32x16xbf16, #tpu.memory_space<vmem>>, vector<32x16xbf16>
    %3 = arith.truncf %1 : vector<16x256xf32> to vector<16x256xbf16>
    %cst = arith.constant dense<0.000000e+00> : vector<32x256xf32>
    %4 = tpu.matmul %2, %3, %cst {dimension_numbers = #tpu.dot_dimension_numbers<[1], [0], [0], [1], [0, 0, 1, 1], [], []>} : vector<32x16xbf16>, vector<16x256xbf16>, vector<32x256xf32> -> vector<32x256xf32>
    %c0_4 = arith.constant 0 : index
    %c0_5 = arith.constant 0 : index
    %5 = vector.load %arg3[%c0_4, %c0_5] : memref<32x1xf32, #tpu.memory_space<vmem>>, vector<32x1xf32>
    %6 = vector.broadcast %5 : vector<32x1xf32> to vector<32x256xf32>
    %7 = arith.addf %4, %6 : vector<32x256xf32>
    %cst_6 = arith.constant 3.000000e+00 : f32
    %8 = vector.broadcast %cst_6 : f32 to vector<32x256xf32>
    %9 = arith.addf %7, %8 : vector<32x256xf32>
    %cst_7 = arith.constant 0.000000e+00 : f32
    %cst_8 = arith.constant 6.000000e+00 : f32
    %10 = vector.broadcast %cst_7 : f32 to vector<32x256xf32>
    %11 = arith.maximumf %10, %9 : vector<32x256xf32>
    %12 = vector.broadcast %cst_8 : f32 to vector<32x256xf32>
    %13 = arith.minimumf %12, %11 : vector<32x256xf32>
    %14 = arith.mulf %7, %13 : vector<32x256xf32>
    %cst_9 = arith.constant 6.000000e+00 : f32
    %15 = vector.broadcast %cst_9 : f32 to vector<32x256xf32>
    %16 = arith.divf %14, %15 : vector<32x256xf32>
    %c0_10 = arith.constant 0 : index
    %c4 = arith.constant 4 : index
    %17 = vector.load %arg4[%c0_10, %c4] : memref<32x9xf32, #tpu.memory_space<vmem>>, vector<32x1xf32>
    %18 = vector.broadcast %17 : vector<32x1xf32> to vector<32x256xf32>
    %19 = arith.mulf %16, %18 : vector<32x256xf32>
    %c17_i32 = arith.constant 17 : i32
    %20 = tpu.dynamic_rotate %16 by %c17_i32 dim 1 : vector<32x256xf32>, i32 -> vector<32x256xf32>
    %c0_11 = arith.constant 0 : index
    %c0_12 = arith.constant 0 : index
    %21 = vector.load %arg6[%c0_11, %c0_12] : memref<9x256xf32, #tpu.memory_space<vmem>>, vector<1x256xf32>
    %22 = vector.broadcast %21 : vector<1x256xf32> to vector<32x256xf32>
    %23 = arith.mulf %20, %22 : vector<32x256xf32>
    %c0_13 = arith.constant 0 : index
    %c0_14 = arith.constant 0 : index
    %24 = vector.load %arg4[%c0_13, %c0_14] : memref<32x9xf32, #tpu.memory_space<vmem>>, vector<32x1xf32>
    %25 = vector.broadcast %24 : vector<32x1xf32> to vector<32x256xf32>
    %26 = arith.mulf %23, %25 : vector<32x256xf32>
    %27 = arith.addf %19, %26 : vector<32x256xf32>
    %c16_i32 = arith.constant 16 : i32
    %28 = tpu.dynamic_rotate %16 by %c16_i32 dim 1 : vector<32x256xf32>, i32 -> vector<32x256xf32>
    %c1 = arith.constant 1 : index
    %c0_15 = arith.constant 0 : index
    %29 = vector.load %arg6[%c1, %c0_15] : memref<9x256xf32, #tpu.memory_space<vmem>>, vector<1x256xf32>
    %30 = vector.broadcast %29 : vector<1x256xf32> to vector<32x256xf32>
    %31 = arith.mulf %28, %30 : vector<32x256xf32>
    %c0_16 = arith.constant 0 : index
    %c1_17 = arith.constant 1 : index
    %32 = vector.load %arg4[%c0_16, %c1_17] : memref<32x9xf32, #tpu.memory_space<vmem>>, vector<32x1xf32>
    %33 = vector.broadcast %32 : vector<32x1xf32> to vector<32x256xf32>
    %34 = arith.mulf %31, %33 : vector<32x256xf32>
    %35 = arith.addf %27, %34 : vector<32x256xf32>
    %c15_i32 = arith.constant 15 : i32
    %36 = tpu.dynamic_rotate %16 by %c15_i32 dim 1 : vector<32x256xf32>, i32 -> vector<32x256xf32>
    %c2 = arith.constant 2 : index
    %c0_18 = arith.constant 0 : index
    %37 = vector.load %arg6[%c2, %c0_18] : memref<9x256xf32, #tpu.memory_space<vmem>>, vector<1x256xf32>
    %38 = vector.broadcast %37 : vector<1x256xf32> to vector<32x256xf32>
    %39 = arith.mulf %36, %38 : vector<32x256xf32>
    %c0_19 = arith.constant 0 : index
    %c2_20 = arith.constant 2 : index
    %40 = vector.load %arg4[%c0_19, %c2_20] : memref<32x9xf32, #tpu.memory_space<vmem>>, vector<32x1xf32>
    %41 = vector.broadcast %40 : vector<32x1xf32> to vector<32x256xf32>
    %42 = arith.mulf %39, %41 : vector<32x256xf32>
    %43 = arith.addf %35, %42 : vector<32x256xf32>
    %c1_i32 = arith.constant 1 : i32
    %44 = tpu.dynamic_rotate %16 by %c1_i32 dim 1 : vector<32x256xf32>, i32 -> vector<32x256xf32>
    %c3 = arith.constant 3 : index
    %c0_21 = arith.constant 0 : index
    %45 = vector.load %arg6[%c3, %c0_21] : memref<9x256xf32, #tpu.memory_space<vmem>>, vector<1x256xf32>
    %46 = vector.broadcast %45 : vector<1x256xf32> to vector<32x256xf32>
    %47 = arith.mulf %44, %46 : vector<32x256xf32>
    %c0_22 = arith.constant 0 : index
    %c3_23 = arith.constant 3 : index
    %48 = vector.load %arg4[%c0_22, %c3_23] : memref<32x9xf32, #tpu.memory_space<vmem>>, vector<32x1xf32>
    %49 = vector.broadcast %48 : vector<32x1xf32> to vector<32x256xf32>
    %50 = arith.mulf %47, %49 : vector<32x256xf32>
    %51 = arith.addf %43, %50 : vector<32x256xf32>
    %c255_i32 = arith.constant 255 : i32
    %52 = tpu.dynamic_rotate %16 by %c255_i32 dim 1 : vector<32x256xf32>, i32 -> vector<32x256xf32>
    %c5 = arith.constant 5 : index
    %c0_24 = arith.constant 0 : index
    %53 = vector.load %arg6[%c5, %c0_24] : memref<9x256xf32, #tpu.memory_space<vmem>>, vector<1x256xf32>
    %54 = vector.broadcast %53 : vector<1x256xf32> to vector<32x256xf32>
    %55 = arith.mulf %52, %54 : vector<32x256xf32>
    %c0_25 = arith.constant 0 : index
    %c5_26 = arith.constant 5 : index
    %56 = vector.load %arg4[%c0_25, %c5_26] : memref<32x9xf32, #tpu.memory_space<vmem>>, vector<32x1xf32>
    %57 = vector.broadcast %56 : vector<32x1xf32> to vector<32x256xf32>
    %58 = arith.mulf %55, %57 : vector<32x256xf32>
    %59 = arith.addf %51, %58 : vector<32x256xf32>
    %c241_i32 = arith.constant 241 : i32
    %60 = tpu.dynamic_rotate %16 by %c241_i32 dim 1 : vector<32x256xf32>, i32 -> vector<32x256xf32>
    %c6 = arith.constant 6 : index
    %c0_27 = arith.constant 0 : index
    %61 = vector.load %arg6[%c6, %c0_27] : memref<9x256xf32, #tpu.memory_space<vmem>>, vector<1x256xf32>
    %62 = vector.broadcast %61 : vector<1x256xf32> to vector<32x256xf32>
    %63 = arith.mulf %60, %62 : vector<32x256xf32>
    %c0_28 = arith.constant 0 : index
    %c6_29 = arith.constant 6 : index
    %64 = vector.load %arg4[%c0_28, %c6_29] : memref<32x9xf32, #tpu.memory_space<vmem>>, vector<32x1xf32>
    %65 = vector.broadcast %64 : vector<32x1xf32> to vector<32x256xf32>
    %66 = arith.mulf %63, %65 : vector<32x256xf32>
    %67 = arith.addf %59, %66 : vector<32x256xf32>
    %c240_i32 = arith.constant 240 : i32
    %68 = tpu.dynamic_rotate %16 by %c240_i32 dim 1 : vector<32x256xf32>, i32 -> vector<32x256xf32>
    %c7 = arith.constant 7 : index
    %c0_30 = arith.constant 0 : index
    %69 = vector.load %arg6[%c7, %c0_30] : memref<9x256xf32, #tpu.memory_space<vmem>>, vector<1x256xf32>
    %70 = vector.broadcast %69 : vector<1x256xf32> to vector<32x256xf32>
    %71 = arith.mulf %68, %70 : vector<32x256xf32>
    %c0_31 = arith.constant 0 : index
    %c7_32 = arith.constant 7 : index
    %72 = vector.load %arg4[%c0_31, %c7_32] : memref<32x9xf32, #tpu.memory_space<vmem>>, vector<32x1xf32>
    %73 = vector.broadcast %72 : vector<32x1xf32> to vector<32x256xf32>
    %74 = arith.mulf %71, %73 : vector<32x256xf32>
    %75 = arith.addf %67, %74 : vector<32x256xf32>
    %c239_i32 = arith.constant 239 : i32
    %76 = tpu.dynamic_rotate %16 by %c239_i32 dim 1 : vector<32x256xf32>, i32 -> vector<32x256xf32>
    %c8 = arith.constant 8 : index
    %c0_33 = arith.constant 0 : index
    %77 = vector.load %arg6[%c8, %c0_33] : memref<9x256xf32, #tpu.memory_space<vmem>>, vector<1x256xf32>
    %78 = vector.broadcast %77 : vector<1x256xf32> to vector<32x256xf32>
    %79 = arith.mulf %76, %78 : vector<32x256xf32>
    %c0_34 = arith.constant 0 : index
    %c8_35 = arith.constant 8 : index
    %80 = vector.load %arg4[%c0_34, %c8_35] : memref<32x9xf32, #tpu.memory_space<vmem>>, vector<32x1xf32>
    %81 = vector.broadcast %80 : vector<32x1xf32> to vector<32x256xf32>
    %82 = arith.mulf %79, %81 : vector<32x256xf32>
    %83 = arith.addf %75, %82 : vector<32x256xf32>
    %c0_36 = arith.constant 0 : index
    %c0_37 = arith.constant 0 : index
    %84 = vector.load %arg5[%c0_36, %c0_37] : memref<32x1xf32, #tpu.memory_space<vmem>>, vector<32x1xf32>
    %85 = vector.broadcast %84 : vector<32x1xf32> to vector<32x256xf32>
    %86 = arith.addf %83, %85 : vector<32x256xf32>
    %cst_38 = arith.constant dense<0.000000e+00> : vector<32xf32>
    %87 = vector.multi_reduction <add>, %86, %cst_38 [1] : vector<32x256xf32> to vector<32xf32>
    %88 = vector.shape_cast %87 : vector<32xf32> to vector<32x1xf32>
    %cst_39 = arith.constant 2.560000e+02 : f32
    %89 = vector.broadcast %cst_39 : f32 to vector<32x1xf32>
    %90 = arith.divf %88, %89 : vector<32x1xf32>
    %c0_40 = arith.constant 0 : index
    %c0_41 = arith.constant 0 : index
    %91 = vector.load %arg7[%c0_40, %c0_41] : memref<8x32xf32, #tpu.memory_space<vmem>>, vector<8x32xf32>
    %cst_42 = arith.constant dense<0.000000e+00> : vector<8x1xf32>
    %92 = tpu.matmul %91, %90, %cst_42 {dimension_numbers = #tpu.dot_dimension_numbers<[1], [0], [0], [1], [0, 0, 1, 1], [], []>} : vector<8x32xf32>, vector<32x1xf32>, vector<8x1xf32> -> vector<8x1xf32>
    %cst_43 = arith.constant 0.000000e+00 : f32
    %93 = vector.broadcast %cst_43 : f32 to vector<8x1xf32>
    %94 = arith.maximumf %92, %93 : vector<8x1xf32>
    %c0_44 = arith.constant 0 : index
    %c0_45 = arith.constant 0 : index
    %95 = vector.load %arg8[%c0_44, %c0_45] : memref<32x8xf32, #tpu.memory_space<vmem>>, vector<32x8xf32>
    %cst_46 = arith.constant dense<0.000000e+00> : vector<32x1xf32>
    %96 = tpu.matmul %95, %94, %cst_46 {dimension_numbers = #tpu.dot_dimension_numbers<[1], [0], [0], [1], [0, 0, 1, 1], [], []>} : vector<32x8xf32>, vector<8x1xf32>, vector<32x1xf32> -> vector<32x1xf32>
    %cst_47 = arith.constant 3.000000e+00 : f32
    %97 = vector.broadcast %cst_47 : f32 to vector<32x1xf32>
    %98 = arith.addf %96, %97 : vector<32x1xf32>
    %cst_48 = arith.constant 0.000000e+00 : f32
    %cst_49 = arith.constant 6.000000e+00 : f32
    %99 = vector.broadcast %cst_48 : f32 to vector<32x1xf32>
    %100 = arith.maximumf %99, %98 : vector<32x1xf32>
    %101 = vector.broadcast %cst_49 : f32 to vector<32x1xf32>
    %102 = arith.minimumf %101, %100 : vector<32x1xf32>
    %cst_50 = arith.constant 6.000000e+00 : f32
    %103 = vector.broadcast %cst_50 : f32 to vector<32x1xf32>
    %104 = arith.divf %102, %103 : vector<32x1xf32>
    %105 = vector.broadcast %104 : vector<32x1xf32> to vector<32x256xf32>
    %106 = arith.mulf %86, %105 : vector<32x256xf32>
    %cst_51 = arith.constant 3.000000e+00 : f32
    %107 = vector.broadcast %cst_51 : f32 to vector<32x256xf32>
    %108 = arith.addf %106, %107 : vector<32x256xf32>
    %cst_52 = arith.constant 0.000000e+00 : f32
    %cst_53 = arith.constant 6.000000e+00 : f32
    %109 = vector.broadcast %cst_52 : f32 to vector<32x256xf32>
    %110 = arith.maximumf %109, %108 : vector<32x256xf32>
    %111 = vector.broadcast %cst_53 : f32 to vector<32x256xf32>
    %112 = arith.minimumf %111, %110 : vector<32x256xf32>
    %113 = arith.mulf %106, %112 : vector<32x256xf32>
    %cst_54 = arith.constant 6.000000e+00 : f32
    %114 = vector.broadcast %cst_54 : f32 to vector<32x256xf32>
    %115 = arith.divf %113, %114 : vector<32x256xf32>
    %c0_55 = arith.constant 0 : index
    %c0_56 = arith.constant 0 : index
    %116 = vector.load %arg9[%c0_55, %c0_56] : memref<16x32xbf16, #tpu.memory_space<vmem>>, vector<16x32xbf16>
    %117 = arith.truncf %115 : vector<32x256xf32> to vector<32x256xbf16>
    %cst_57 = arith.constant dense<0.000000e+00> : vector<16x256xf32>
    %118 = tpu.matmul %116, %117, %cst_57 {dimension_numbers = #tpu.dot_dimension_numbers<[1], [0], [0], [1], [0, 0, 1, 1], [], []>} : vector<16x32xbf16>, vector<32x256xbf16>, vector<16x256xf32> -> vector<16x256xf32>
    %c0_58 = arith.constant 0 : index
    %c0_59 = arith.constant 0 : index
    %119 = vector.load %arg10[%c0_58, %c0_59] : memref<16x1xf32, #tpu.memory_space<vmem>>, vector<16x1xf32>
    %120 = vector.broadcast %119 : vector<16x1xf32> to vector<16x256xf32>
    %121 = arith.addf %118, %120 : vector<16x256xf32>
    %122 = arith.addf %121, %1 : vector<16x256xf32>
    %c0_60 = arith.constant 0 : index
    %c0_61 = arith.constant 0 : index
    %c0_62 = arith.constant 0 : index
    %123 = vector.load %arg11[%c0_60, %c0_61, %c0_62] : memref<1x16x256xf32, #tpu.memory_space<vmem>>, vector<1x16x256xf32>
    %124 = vector.shape_cast %123 : vector<1x16x256xf32> to vector<16x256xf32>
    %125 = vector.shape_cast %122 : vector<16x256xf32> to vector<1x16x256xf32>
    tpu.vector_store %arg11[%c0_60, %c0_61, %c0_62], %125 {strides = array<i32>} : memref<1x16x256xf32, #tpu.memory_space<vmem>>, vector<1x16x256xf32>,
    return
  }
  func.func @transform_0(%arg0: i32) -> (i32, i32, i32) {
    %c0_i32 = arith.constant 0 : i32
    %c0_i32_0 = arith.constant 0 : i32
    %c0_i32_1 = arith.constant 0 : i32
    return %arg0, %c0_i32, %c0_i32_0 : i32, i32, i32
  }
  func.func @transform_1(%arg0: i32) -> (i32, i32) {
    %c0_i32 = arith.constant 0 : i32
    %c0_i32_0 = arith.constant 0 : i32
    %c0_i32_1 = arith.constant 0 : i32
    return %c0_i32, %c0_i32_0 : i32, i32
  }
  func.func @transform_2(%arg0: i32) -> (i32, i32) {
    %c0_i32 = arith.constant 0 : i32
    %c0_i32_0 = arith.constant 0 : i32
    %c0_i32_1 = arith.constant 0 : i32
    return %c0_i32, %c0_i32_0 : i32, i32
  }
  func.func @transform_3(%arg0: i32) -> (i32, i32) {
    %c0_i32 = arith.constant 0 : i32
    %c0_i32_0 = arith.constant 0 : i32
    %c0_i32_1 = arith.constant 0 : i32
    return %c0_i32, %c0_i32_0 : i32, i32
  }
  func.func @transform_4(%arg0: i32) -> (i32, i32) {
    %c0_i32 = arith.constant 0 : i32
    %c0_i32_0 = arith.constant 0 : i32
    %c0_i32_1 = arith.constant 0 : i32
    return %c0_i32, %c0_i32_0 : i32, i32
  }
  func.func @transform_5(%arg0: i32) -> (i32, i32) {
    %c0_i32 = arith.constant 0 : i32
    %c0_i32_0 = arith.constant 0 : i32
    %c0_i32_1 = arith.constant 0 : i32
    return %c0_i32, %c0_i32_0 : i32, i32
  }
  func.func @transform_6(%arg0: i32) -> (i32, i32) {
    %c0_i32 = arith.constant 0 : i32
    %c0_i32_0 = arith.constant 0 : i32
    %c0_i32_1 = arith.constant 0 : i32
    return %c0_i32, %c0_i32_0 : i32, i32
  }
  func.func @transform_7(%arg0: i32) -> (i32, i32) {
    %c0_i32 = arith.constant 0 : i32
    %c0_i32_0 = arith.constant 0 : i32
    %c0_i32_1 = arith.constant 0 : i32
    return %c0_i32, %c0_i32_0 : i32, i32
  }
  func.func @transform_8(%arg0: i32) -> (i32, i32) {
    %c0_i32 = arith.constant 0 : i32
    %c0_i32_0 = arith.constant 0 : i32
    %c0_i32_1 = arith.constant 0 : i32
    return %c0_i32, %c0_i32_0 : i32, i32
  }
  func.func @transform_9(%arg0: i32) -> (i32, i32) {
    %c0_i32 = arith.constant 0 : i32
    %c0_i32_0 = arith.constant 0 : i32
    %c0_i32_1 = arith.constant 0 : i32
    return %c0_i32, %c0_i32_0 : i32, i32
  }
  func.func @transform_10(%arg0: i32) -> (i32, i32, i32) {
    %c0_i32 = arith.constant 0 : i32
    %c0_i32_0 = arith.constant 0 : i32
    %c0_i32_1 = arith.constant 0 : i32
    return %arg0, %c0_i32, %c0_i32_0 : i32, i32, i32
  }
}

</mosaic_0001>

<bundles_post_ra>
// kernel: tpu_custom_call.1
= control target key start
LH: loop header
LB: loop body
LE: loop exit
PB: predicated region body
PF: predicated region fallthrough
CT: control target
= control target key end

     0   :  { %s2626_s0 = inlined_call_operand.vmem [shape: f32[2,16,256], index: 0, kind: input, shape index: {}]   ;;  %s2627_s1 = inlined_call_operand.vmem [shape: bf16[32,16], index: 1, kind: input, shape index: {}]   ;;  %s2628_s2 = inlined_call_operand.vmem [shape: f32[32,1], index: 2, kind: input, shape index: {}]   ;;  %s2629_s3 = inlined_call_operand.vmem [shape: f32[32,9], index: 3, kind: input, shape index: {}]   ;;  %s2630_s4 = inlined_call_operand.vmem [shape: f32[32,1], index: 4, kind: input, shape index: {}]   ;;  %s2631_s5 = inlined_call_operand.vmem [shape: f32[9,256], index: 5, kind: input, shape index: {}]   ;;  %s2632_s6 = inlined_call_operand.vmem [shape: f32[8,32], index: 6, kind: input, shape index: {}]   ;;  %s2633_s7 = inlined_call_operand.vmem [shape: f32[32,8], index: 7, kind: input, shape index: {}]   ;;  %s2634_s8 = inlined_call_operand.vmem [shape: bf16[16,32], index: 8, kind: input, shape index: {}]   ;;  %s2635_s9 = inlined_call_operand.vmem [shape: f32[16,1], index: 9, kind: input, shape index: {}]   ;;  %s2636_s10 = inlined_call_operand.hbm [shape: f32[2,16,256], index: 10, kind: output, shape index: {}]  }
   0x1   :  { %2640 = sst [smem:[#allocation5_spill]] %s2626_s0 }
   0x2   :  { %15 = vsyncpa [#allocation3], 0 }
   0x3   :  { %17 = vsyncpa [#allocation3 + $0x1], 0  ;;  %s1733_s13 = smov 0   ;;  %s1735_s14 = smov 0  }
   0x4   :  { %s1737_s15 = smov 0   ;;  %s1739_s16 = smov 0  }
   0x5 LB: > { %s1754_s17 = sadd.s32 4294967295, %s1656_s16   ;;  %s1451_s18 = sadd.s32 4294967294, %s1656_s16   ;;  %s1656_s16 = sphi %s1739_s16, %s2649_s16   ;;  %s1652_s15 = sphi %s1737_s15, %s2648_s15   ;;  %s1648_s14 = sphi %s1735_s14, %s2647_s14   ;;  %s1644_s13 = sphi %s1733_s13, %s2646_s13  }
   0x6   : > { %s1758_s19 = sadd.s32 1, %s1656_s16   ;;  %s245_s20 = sadd.s32 1, %s1652_s15 }
   0x7   : > { %s242_s21 = ssub.s32 %s1656_s16, %s1758_s19  ;;  %p255_p0 = scmp.ne.s32.totalorder %s1652_s15, %s1648_s14 }
   0x8   : > { %p243_p1 = scmp.eq.s32.totalorder %s242_s21, 0  ;;  %p256_p2 = scmp.eq.s32.totalorder %s1754_s17, 1 }
   0x9   : > { %p261_p3 = scmp.ne.s32.totalorder %s1648_s14, %s1644_s13  ;;  %p262_p4 = scmp.eq.s32.totalorder %s1451_s18, 1 }
   0xa   : > { %s1769_s22 = scalar_select %p243_p1, %s1652_s15, %s245_s20  }
   0xb   : > { %p1771_p5 = por %p256_p2, %p255_p0  ;;  %p1775_p6 = por %p262_p4, %p261_p3 }
   0xc   : > { %p1454_p7 = scmp.ge.s32.totalorder %s1656_s16, 1  ;;  %p315_p8 = scmp.lt.s32.totalorder %s1656_s16, 3 }
   0xe   : > { %p316_p9 = pnand %p1454_p7, %p315_p8 }
   0xf   : > { %p353_p10 = scmp.lt.s32.totalorder (!%p316_p9), %s1754_s17, 1  ;;  %s2643_s0 = sld [smem:[#allocation5_spill]] (!%p316_p9) }
  0x10   : > { %319 = sbr.rel (%p316_p9) target bundleno = 1252 (0x4e4), region = 60  ;;  %s2639_s30 = smov (!%p316_p9), 16  }
  0x11   : > { %s1667_s11 = smov (!%p316_p9), 15   ;;  %s1669_s18 = smov (!%p316_p9), 127  }
  0x12   : > { %s1670_s20 = smov (!%p316_p9), 113   ;;  %s1671_s25 = smov (!%p316_p9), 112  }
  0x13   : > { %s1497_s26 = sshll.u32 (!%p316_p9), %s1754_s17, 5  ;;  %s1614_s28 = scalar_lea.hbm (!%p316_p9), %s2636_s10, 64 }
  0x15   : > { %v370_v0 = vld [vmem:[%s2628_s2 + $0x8] sm:$0xff]  ;;  %v2637_v1 = vmov 0   ;;  %v372_v2 = vld [vmem:[%s2628_s2 + $0x18] sm:$0xff]  ;;  %s354_s29 = scalar_select %p353_p10, %s1754_s17, 1  ;;  %v369_v9 = vld [vmem:[%s2628_s2] sm:$0xff]  ;;  %vm403_vm0 = vcmask 130048  }
  0x16   : > { %1558 = vset.pattern.permute.xlu1 %v2637_v1  ;;  %1557 = vset.pattern.permute.xlu0 %v2637_v1  ;;  %v1794_v3 = vld [vmem:[%s2629_s3 + $0x18] sm:$0xff]  ;;  %v1494_v11 = vld [vmem:[%s2627_s1] sm:$0xff]  ;;  %v371_v12 = vld [vmem:[%s2628_s2 + $0x10] sm:$0xff]  ;;  %v1659_v13 = vmov 1   ;;  %v1660_v14 = vmov 4   ;;  %v1661_v19 = vmov 2  }
  0x17   : > { %380 = vperm.xlu1 %1558, %v370_v0   ;;  %390 = vperm.xlu0 %1557, %v372_v2   ;;  %s1493_s12 = sshll.u32 %s354_s29, 5  ;;  %v1823_v15 = vld [vmem:[%s2629_s3 + $0x10] sm:$0xff]  ;;  %v1495_v16 = vld [vmem:[%s2627_s1 + $0x8] sm:$0xff]  ;;  %v1843_v18 = vld [vmem:[%s2629_s3] sm:$0xff]  ;;  %v1662_v20 = vmov 3   ;;  %v1663_v21 = vmov 5  }
  0x18   : > { %1560 = vset.pattern.permute.xlu2 %v2637_v1  ;;  %s1801_s21 = scalar_lea.vmem %s2643_s0, %s1493_s12  ;;  %v1834_v17 = vld [vmem:[%s2629_s3 + $0x8] sm:$0xff]  ;;  %v1664_v22 = vmov 6.0   ;;  %s1665_s29 = smov 17   ;;  %vm1160_vm11 = vcmask 261120   ;;  %vm1189_vm12 = vcmask 64512  }
  0x19   : > { %581 = vperm.xlu2 %1560, %v1794_v3   ;;  %v359_v4 = vld [vmem:[%s1801_s21] sm:$0xff]  ;;  %v361_v5 = vld [vmem:[%s1801_s21 + $0x10] sm:$0xff]  ;;  %v360_v6 = vld [vmem:[%s1801_s21 + $0x8] sm:$0xff]  ;;  %1586 = vrcp.f32 %v1664_v22  ;;  %s1668_s12 = smov 1  }
  0x1a   : > { %v367_v7 = vpack.c.bf16 %v361_v5, %v359_v4  ;;  %v362_v8 = vld [vmem:[%s1801_s21 + $0x18] sm:$0xff] }
  0x1b   : > { %v368_v10 = vpack.c.bf16 %v362_v8, %v360_v6 }
  0x1c   : > { %417 = vmatpush.bf16.msra.mxu0 %v367_v7 }
  0x1d   : > { %436 = vmatpush.bf16.msra.mxu1 %v368_v10 }
  0x1f   : > { %375 = vperm.xlu1 %1558, %v369_v9   ;;  %385 = vperm.xlu0 %1557, %v371_v12   ;;  %v1587_v23 = vpop.eup %1586 }
  0x20   : > { %1466 = vmatmul.msk.bf16.vlgmr.msra.gmra.mxu0 %vm403_vm0, %v1494_v11  ;;  %1468 = vmatmul.msk.bf16.vlgmr.msra.gmra.mxu1 %vm403_vm0, %v1494_v11  ;;  %v481_v25 = vmul.f32 6.0, %v1587_v23  ;;  %vm485_vm1 = vweird.f32 %v1587_v23 }
  0x21   : > { %1563 = vset.pattern.permute.xlu2 %v1659_v13 }
  0x22   : > { %653 = vperm.xlu2 %1563, %v1794_v3   ;;  %v482_v26 = vsub.f32 1.0, %v481_v25 }
  0x24   : > { %v483_v29 = vmul.f32 %v1587_v23, %v482_v26 }
  0x26   : > { %v484_v34 = vadd.f32 %v1587_v23, %v483_v29 }
  0x27   : > { %1559 = vset.pattern.permute.xlu1 %v1660_v14  ;;  %1561 = vset.pattern.permute.xlu0 %v1660_v14 }
  0x28   : > { %516 = vperm.xlu1 %1559, %v1794_v3   ;;  %511 = vperm.xlu0 %1561, %v1823_v15   ;;  %v1859_v39 = vsel %vm485_vm1, %v1587_v23, %v484_v34 }
  0x2a   : > { %649 = vperm.xlu2 %1563, %v1823_v15  }
  0x30   : > { %1562 = vset.pattern.permute.xlu1 %v2637_v1  ;;  %506 = vperm.xlu0 %1561, %v1834_v17  }
  0x31   : > { %577 = vperm.xlu1 %1562, %v1823_v15   ;;  %1467 = vmatmul.msk.bf16.gmra.mxu0 %vm403_vm0, %v1495_v16 }
  0x32   : > { %1469 = vmatmul.msk.bf16.gmra.mxu1 %vm403_vm0, %v1495_v16  ;;  %1566 = vset.pattern.permute.xlu2 %v2637_v1 }
  0x33   : > { %569 = vperm.xlu2 %1566, %v1843_v18  }
  0x38   : > { %1564 = vset.pattern.permute.xlu0 %v1661_v19 }
  0x39   : > { %573 = vperm.xlu1 %1562, %v1834_v17   ;;  %725 = vperm.xlu0 %1564, %v1794_v3  }
  0x3b   : > { %1569 = vset.pattern.permute.xlu2 %v1662_v20 }
  0x3c   : > { %797 = vperm.xlu2 %1569, %v1794_v3  }
  0x41   : > { %1565 = vset.pattern.permute.xlu1 %v1660_v14  ;;  %1567 = vset.pattern.permute.xlu0 %v1659_v13 }
  0x42   : > { %501 = vperm.xlu1 %1565, %v1843_v18   ;;  %645 = vperm.xlu0 %1567, %v1834_v17  }
  0x44   : > { %793 = vperm.xlu2 %1569, %v1823_v15  }
  0x4a   : > { %1568 = vset.pattern.permute.xlu1 %v1661_v19  ;;  %641 = vperm.xlu0 %1567, %v1843_v18  }
  0x4b   : > { %721 = vperm.xlu1 %1568, %v1823_v15  }
  0x52   : > { %1570 = vset.pattern.permute.xlu0 %v1663_v21 }
  0x53   : > { %717 = vperm.xlu1 %1568, %v1834_v17   ;;  %869 = vperm.xlu0 %1570, %v1794_v3  }
  0x73   : > { %v1898_v11 = vpop.permute.xlu2 %581 }
  0x7c   : > { %v1915_v14 = vpop.permute.xlu2 %653 }
  0x89   : > { %v381_v24 = vpop.permute.xlu1 %380  ;;  %v391_v44 = vpop.permute.xlu0 %390 }
  0x91   : > { %v376_v27 = vpop.permute.xlu1 %375  ;;  %v386_v55 = vpop.permute.xlu0 %385 }
  0x9d   : > { %v419_v28 = vpop.f32.mrf.mxu0  ;;  %v438_v31 = vpop.f32.mrf.mxu1 }
  0x9e   : > { %v420_v30 = vadd.f32 %v419_v28, %v376_v27  ;;  %v439_v32 = vadd.f32 %v438_v31, %v376_v27  ;;  %v1931_v27 = vpop.permute.xlu1 %516 }
  0xa0   : > { %v448_v33 = vadd.f32 3.0, %v420_v30  ;;  %v449_v35 = vadd.f32 3.0, %v439_v32 }
  0xa2   : > { %v456_v36 = vmax.f32 %v448_v33, 0.0  ;;  %v457_v37 = vmax.f32 %v449_v35, 0.0  ;;  %v1933_v33 = vpop.permute.xlu0 %511 }
  0xa4   : > { %v464_v38 = vmin.f32 %v456_v36, 6.0  ;;  %v465_v40 = vmin.f32 %v457_v37, 6.0 }
  0xa5   : > { %v421_v41 = vpop.f32.mrf.mxu0  ;;  %v440_v52 = vpop.f32.mrf.mxu1 }
  0xa6   : > { %v472_v42 = vmul.f32 %v464_v38, %v420_v30  ;;  %v422_v43 = vadd.f32 %v421_v41, %v381_v24  ;;  %v473_v45 = vmul.f32 %v465_v40, %v439_v32  ;;  %v441_v57 = vadd.f32 %v440_v52, %v381_v24  ;;  %v1923_v24 = vpop.permute.xlu2 %649  ;;  %v1941_v36 = vpop.permute.xlu1 %577 }
  0xa8   : > { %v1862_v46 = vmul.f32 %v1859_v39, %v472_v42  ;;  %v450_v47 = vadd.f32 3.0, %v422_v43  ;;  %v1865_v48 = vmul.f32 %v1859_v39, %v473_v45  ;;  %v451_v60 = vadd.f32 3.0, %v441_v57 }
  0xaa   : > { %v458_v49 = vmax.f32 %v450_v47, 0.0  ;;  %527 = vrot.lane.b32.xlu1 %v1862_v46, %s1665_s29  ;;  %535 = vrot.lane.b32.xlu2 %v1865_v48, %s1665_s29  ;;  %v459_v63 = vmax.f32 %v451_v60, 0.0  ;;  %v1957_v41 = vpop.permute.xlu0 %506 }
  0xac   : > { %v466_v50 = vmin.f32 %v458_v49, 6.0  ;;  %v467_v4 = vmin.f32 %v459_v63, 6.0 }
  0xae   : > { %v474_v51 = vmul.f32 %v466_v50, %v422_v43  ;;  %v424_v53 = vpop.f32.mrf.mxu0  ;;  %v475_v7 = vmul.f32 %v467_v4, %v441_v57  ;;  %v570_v30 = vpop.permute.xlu2 %569 }
  0xaf   : > { %v425_v56 = vadd.f32 %v424_v53, %v386_v55  ;;  %v443_v59 = vpop.f32.mrf.mxu1  ;;  %v1959_v42 = vpop.permute.xlu1 %573  ;;  %v543_v53 = vlaneseq }
  0xb0   : > { %v1872_v54 = vmul.f32 %v1859_v39, %v474_v51  ;;  %v444_v62 = vadd.f32 %v443_v59, %v386_v55  ;;  %v1896_v10 = vmul.f32 %v1859_v39, %v475_v7 }
  0xb1   : > { %v452_v58 = vadd.f32 3.0, %v425_v56  ;;  %v1994_v57 = vand.u32 127, %v543_v53 }
  0xb2   : > { %529 = vrot.lane.b32.xlu0 %v1872_v54, %s1665_s29  ;;  %600 = vrot.lane.b32.xlu1 %v1862_v46, %s2639_s30  ;;  %v453_v2 = vadd.f32 3.0, %v444_v62 }
  0xb3   : > { %608 = vrot.lane.b32.xlu2 %v1865_v48, %s2639_s30  ;;  %v460_v61 = vmax.f32 %v452_v58, 0.0  ;;  %v554_v58 = vld [vmem:[%s2631_s5] ss:$8 sm:$0x3]  ;;  %vm545_vm2 = vcmp.lt.s32.totalorder %v1994_v57, 17  ;;  %vm616_vm3 = vcmp.lt.s32.totalorder %v1994_v57, 16 }
  0xb4   : > { %v461_v6 = vmax.f32 %v453_v2, 0.0  ;;  %v2006_v60 = vperm.slane %v554_v58, 0  ;;  %vm688_vm4 = vcmp.lt.s32.totalorder %v1994_v57, 15  ;;  %vm760_vm5 = vcmp.lt.s32.totalorder %v1994_v57, 1 }
  0xb5   : > { %v468_v0 = vmin.f32 %v460_v61, 6.0  ;;  %v2008_v61 = vperm.slane %v554_v58, 1  ;;  %vm832_vm6 = vcmp.lt.s32.totalorder %v1994_v57, 127  ;;  %vm904_vm7 = vcmp.lt.s32.totalorder %v1994_v57, 113 }
  0xb6   : > { %v469_v9 = vmin.f32 %v461_v6, 6.0  ;;  %v426_v19 = vpop.f32.mrf.mxu0  ;;  %v1949_v40 = vpop.permute.xlu2 %797  ;;  %v1470_v6 = vld [vmem:[%s2631_s5 + $0x1] ss:$8 sm:$0x3]  ;;  %vm976_vm8 = vcmp.lt.s32.totalorder %v1994_v57, 112  ;;  %vm1048_vm9 = vcmp.lt.s32.totalorder %v1994_v57, 111 }
  0xb7   : > { %v476_v5 = vmul.f32 %v468_v0, %v425_v56  ;;  %v445_v16 = vpop.f32.mrf.mxu1  ;;  %v427_v23 = vadd.f32 %v426_v19, %v391_v44  ;;  %v502_v45 = vpop.permute.xlu1 %501 }
  0xb8   : > { %v477_v12 = vmul.f32 %v469_v9, %v444_v62  ;;  %v446_v22 = vadd.f32 %v445_v16, %v391_v44  ;;  %v1969_v44 = vpop.permute.xlu0 %725  ;;  %v519_v7 = vmul.f32 %v502_v45, %v1862_v46  ;;  %v520_v9 = vmul.f32 %v502_v45, %v1865_v48 }
  0xb9   : > { %v1893_v8 = vmul.f32 %v1859_v39, %v476_v5  ;;  %v454_v26 = vadd.f32 3.0, %v427_v23 }
  0xba   : > { %602 = vrot.lane.b32.xlu0 %v1872_v54, %s2639_s30  ;;  %672 = vrot.lane.b32.xlu1 %v1862_v46, %s1667_s11  ;;  %v1907_v13 = vmul.f32 %v1859_v39, %v477_v12  ;;  %v455_v25 = vadd.f32 3.0, %v446_v22 }
  0xbb   : > { %680 = vrot.lane.b32.xlu2 %v1865_v48, %s1667_s11  ;;  %v462_v29 = vmax.f32 %v454_v26, 0.0 }
  0xbc   : > { %v463_v28 = vmax.f32 %v455_v25, 0.0  ;;  %v2029_v25 = vperm.slane %v1470_v6, 1 }
  0xbd   : > { %v470_v32 = vmin.f32 %v462_v29, 6.0 }
  0xbe   : > { %v471_v31 = vmin.f32 %v463_v28, 6.0  ;;  %v1967_v43 = vpop.permute.xlu2 %793 }
  0xbf   : > { %v478_v35 = vmul.f32 %v470_v32, %v427_v23  ;;  %v1979_v50 = vpop.permute.xlu1 %721  ;;  %v2027_v23 = vperm.slane %v1470_v6, 0 }
  0xc0   : > { %v479_v34 = vmul.f32 %v471_v31, %v446_v22  ;;  %v1977_v49 = vpop.permute.xlu0 %645 }
  0xc1   : > { %v1947_v38 = vmul.f32 %v1859_v39, %v478_v35 }
  0xc2   : > { %746 = vrot.lane.b32.xlu0 %v1872_v54, %s1668_s12  ;;  %744 = vrot.lane.b32.xlu1 %v1862_v46, %s1668_s12  ;;  %v1944_v37 = vmul.f32 %v1859_v39, %v479_v34 }
  0xc3   : > { %752 = vrot.lane.b32.xlu2 %v1865_v48, %s1668_s12 }
  0xc7   : > { %v1992_v55 = vpop.permute.xlu1 %717 }
  0xc8   : > { %v642_v52 = vpop.permute.xlu0 %641 }
  0xca   : > { %531 = vrot.lane.b32.xlu0 %v1893_v8, %s1665_s29  ;;  %537 = vrot.lane.b32.xlu1 %v1896_v10, %s1665_s29 }
  0xcb   : > { %682 = vrot.lane.b32.xlu2 %v1896_v10, %s1667_s11 }
  0xd0   : > { %v2003_v59 = vpop.permute.xlu0 %869 }
  0xd2   : > { %612 = vrot.lane.b32.xlu0 %v1907_v13, %s2639_s30  ;;  %610 = vrot.lane.b32.xlu1 %v1896_v10, %s2639_s30 }
  0xd3   : > { %826 = vrot.lane.b32.xlu2 %v1896_v10, %s1669_s18 }
  0xda   : > { %684 = vrot.lane.b32.xlu0 %v1907_v13, %s1667_s11  ;;  %674 = vrot.lane.b32.xlu1 %v1872_v54, %s1667_s11 }
  0xdb   : > { %604 = vrot.lane.b32.xlu2 %v1893_v8, %s2639_s30 }
  0xe2   : > { %748 = vrot.lane.b32.xlu0 %v1893_v8, %s1668_s12  ;;  %754 = vrot.lane.b32.xlu1 %v1896_v10, %s1668_s12 }
  0xe3   : > { %676 = vrot.lane.b32.xlu2 %v1893_v8, %s1667_s11 }
  0xea   : > { %828 = vrot.lane.b32.xlu0 %v1907_v13, %s1669_s18  ;;  %818 = vrot.lane.b32.xlu1 %v1872_v54, %s1669_s18 }
  0xeb   : > { %820 = vrot.lane.b32.xlu2 %v1893_v8, %s1669_s18 }
  0xf2   : > { %614 = vrot.lane.b32.xlu0 %v1944_v37, %s2639_s30  ;;  %539 = vrot.lane.b32.xlu1 %v1907_v13, %s1665_s29 }
  0xf3   : > { %533 = vrot.lane.b32.xlu2 %v1947_v38, %s1665_s29 }
  0xfa   : > { %830 = vrot.lane.b32.xlu0 %v1944_v37, %s1669_s18  ;;  %756 = vrot.lane.b32.xlu1 %v1907_v13, %s1668_s12 }
  0xfb   : > { %541 = vrot.lane.b32.xlu2 %v1944_v37, %s1665_s29  ;;  %s1385_s29 = scalar_lea.hbm %s2636_s10, %s1497_s26 }
 0x102   : > { %892 = vrot.lane.b32.xlu0 %v1893_v8, %s1670_s20  ;;  %678 = vrot.lane.b32.xlu1 %v1947_v38, %s1667_s11 }
 0x103   : > { %606 = vrot.lane.b32.xlu2 %v1947_v38, %s2639_s30 }
 0x104   : > { %v536_v47 = vpop.permute.xlu2 %535 }
 0x10a   : > { %974 = vrot.lane.b32.xlu0 %v1944_v37, %s1671_s25  ;;  %750 = vrot.lane.b32.xlu1 %v1947_v38, %s1668_s12 }
 0x10b   : > { %686 = vrot.lane.b32.xlu2 %v1944_v37, %s1667_s11  ;;  %s1672_s11 = smov 111  }
 0x10d   : > { %v609_v51 = vpop.permute.xlu2 %608 }
 0x112   : > { %865 = vperm.xlu0 %1570, %v1823_v15   ;;  %894 = vrot.lane.b32.xlu1 %v1947_v38, %s1670_s20 }
 0x113   : > { %758 = vrot.lane.b32.xlu2 %v1944_v37, %s1668_s12 }
 0x115   : > { %v681_v56 = vpop.permute.xlu2 %680 }
 0x11a   : > { %824 = vrot.lane.b32.xlu0 %v1865_v48, %s1669_s18  ;;  %900 = vrot.lane.b32.xlu1 %v1907_v13, %s1670_s20 }
 0x11b   : > { %822 = vrot.lane.b32.xlu2 %v1947_v38, %s1669_s18 }
 0x11c   : > { %v528_v62 = vpop.permute.xlu1 %527 }
 0x11d   : > { %v753_v63 = vpop.permute.xlu2 %752  ;;  %v546_v0 = vsel %vm545_vm2, %v528_v62, %v536_v47  ;;  %v550_v2 = vsel %vm545_vm2, %v536_v47, %v528_v62  ;;  %v1673_v47 = vmov 6  }
 0x11e   : > { %v560_v4 = vmul.f32 %v2006_v60, %v550_v2  ;;  %v561_v5 = vmul.f32 %v2008_v61, %v546_v0 }
 0x120   : > { %v584_v12 = vmul.f32 %v570_v30, %v560_v4  ;;  %v585_v16 = vmul.f32 %v570_v30, %v561_v5 }
 0x122   : > { %v592_v19 = vadd.f32 %v584_v12, %v519_v7  ;;  %v593_v22 = vadd.f32 %v585_v16, %v520_v9  ;;  %964 = vrot.lane.b32.xlu0 %v1893_v8, %s1671_s25  ;;  %713 = vperm.xlu1 %1568, %v1843_v18  }
 0x123   : > { %902 = vrot.lane.b32.xlu2 %v1944_v37, %s1670_s20 }
 0x124   : > { %v530_v26 = vpop.permute.xlu0 %529  ;;  %v601_v28 = vpop.permute.xlu1 %600 }
 0x125   : > { %v2033_v29 = vpop.permute.xlu2 %682  ;;  %v617_v30 = vsel %vm616_vm3, %v601_v28, %v609_v51  ;;  %v621_v31 = vsel %vm616_vm3, %v609_v51, %v601_v28  ;;  %v521_v28 = vmul.f32 %v1957_v41, %v1872_v54 }
 0x126   : > { %v632_v32 = vmul.f32 %v2027_v23, %v621_v31  ;;  %v633_v34 = vmul.f32 %v2029_v25, %v617_v30  ;;  %v522_v30 = vmul.f32 %v1957_v41, %v1896_v10 }
 0x128   : > { %v656_v35 = vmul.f32 %v642_v52, %v632_v32  ;;  %v657_v45 = vmul.f32 %v642_v52, %v633_v34 }
 0x12a   : > { %1046 = vrot.lane.b32.xlu0 %v1944_v37, %s1672_s11  ;;  %1571 = vset.pattern.permute.xlu1 %v1673_v47  ;;  %v2045_v53 = vadd.f32 %v657_v45, %v593_v22  ;;  %v2047_v58 = vadd.f32 %v656_v35, %v592_v19 }
 0x12b   : > { %966 = vrot.lane.b32.xlu2 %v1947_v38, %s1671_s25  ;;  %941 = vperm.xlu1 %1571, %v1794_v3  }
 0x12c   : > { %v603_v51 = vpop.permute.xlu0 %602  ;;  %v673_v52 = vpop.permute.xlu1 %672 }
 0x12d   : > { %v2052_v62 = vpop.permute.xlu2 %826  ;;  %v2056_v0 = vsel %vm688_vm4, %v673_v52, %v681_v56  ;;  %v2060_v2 = vsel %vm688_vm4, %v681_v56, %v673_v52 }
 0x132   : > { %970 = vrot.lane.b32.xlu0 %v1896_v10, %s1671_s25 }
 0x133   : > { %789 = vperm.xlu2 %1569, %v1834_v17   ;;  %890 = vrot.lane.b32.xlu1 %v1872_v54, %s1670_s20 }
 0x134   : > { %v2068_v4 = vpop.permute.xlu0 %746  ;;  %v745_v5 = vpop.permute.xlu1 %744  ;;  %1572 = vset.pattern.permute.xlu1 %v1662_v20 }
 0x135   : > { %v605_v6 = vpop.permute.xlu2 %604  ;;  %v2073_v56 = vsel %vm760_vm5, %v745_v5, %v753_v63  ;;  %v2077_v7 = vsel %vm760_vm5, %v753_v63, %v745_v5 }
 0x13a   : > { %857 = vperm.xlu0 %1570, %v1843_v18  }
 0x13b   : > { %816 = vrot.lane.b32.xlu2 %v1862_v46, %s1669_s18  ;;  %972 = vrot.lane.b32.xlu1 %v1907_v13, %s1671_s25  ;;  %s350_s18 = sand.u32 1, %s1648_s14  }
 0x13c   : > { %v2084_v9 = vpop.permute.xlu0 %531  ;;  %v538_v20 = vpop.permute.xlu1 %537  ;;  %1573 = vset.pattern.permute.xlu2 %v1663_v21 }
 0x13d   : > { %v677_v12 = vpop.permute.xlu2 %676  ;;  %v547_v16 = vsel %vm545_vm2, %v530_v26, %v538_v20  ;;  %v551_v63 = vsel %vm545_vm2, %v538_v20, %v530_v26 }
 0x13e   : > { %v562_v19 = vmul.f32 %v2006_v60, %v551_v63  ;;  %v563_v22 = vmul.f32 %v2008_v61, %v547_v16 }
 0x140   : > { %v586_v31 = vmul.f32 %v1959_v42, %v562_v19  ;;  %v587_v21 = vmul.f32 %v1959_v42, %v563_v22  ;;  %v1471_v22 = vld [vmem:[%s2631_s5 + $0x2] ss:$8 sm:$0x3] }
 0x142   : > { %v594_v32 = vadd.f32 %v586_v31, %v521_v28  ;;  %v595_v34 = vadd.f32 %v587_v21, %v522_v30  ;;  %1575 = vset.pattern.permute.xlu0 %v1673_v47  ;;  %v2129_v30 = vperm.slane %v1471_v22, 1  ;;  %v1674_v31 = vmov 7  }
 0x143   : > { %898 = vrot.lane.b32.xlu2 %v1896_v10, %s1670_s20  ;;  %937 = vperm.xlu0 %1575, %v1823_v15  }
 0x144   : > { %785 = vperm.xlu1 %1572, %v1843_v18   ;;  %v613_v26 = vpop.permute.xlu0 %612  ;;  %v611_v35 = vpop.permute.xlu1 %610 }
 0x145   : > { %v821_v45 = vpop.permute.xlu2 %820  ;;  %v2106_v41 = vsel %vm616_vm3, %v605_v6, %v613_v26  ;;  %v2110_v42 = vsel %vm616_vm3, %v613_v26, %v605_v6  ;;  %v618_v52 = vsel %vm616_vm3, %v603_v51, %v611_v35  ;;  %v622_v5 = vsel %vm616_vm3, %v611_v35, %v603_v51 }
 0x146   : > { %v634_v20 = vmul.f32 %v2027_v23, %v622_v5  ;;  %v635_v16 = vmul.f32 %v2029_v25, %v618_v52  ;;  %v2127_v51 = vperm.slane %v1471_v22, 0 }
 0x148   : > { %v658_v63 = vmul.f32 %v1977_v49, %v634_v20  ;;  %v659_v19 = vmul.f32 %v1977_v49, %v635_v16 }
 0x14a   : > { %v666_v6 = vadd.f32 %v658_v63, %v594_v32  ;;  %v667_v28 = vadd.f32 %v659_v19, %v595_v34 }
 0x14b   : > { %1038 = vrot.lane.b32.xlu2 %v1947_v38, %s1672_s11  ;;  %968 = vrot.lane.b32.xlu0 %v1865_v48, %s1671_s25 }
 0x14c   : > { %1574 = vset.pattern.permute.xlu1 %v1674_v31  ;;  %v685_v49 = vpop.permute.xlu0 %684  ;;  %v675_v21 = vpop.permute.xlu1 %674 }
 0x14d   : > { %v534_v26 = vpop.permute.xlu2 %533  ;;  %v691_v32 = vsel %vm688_vm4, %v677_v12, %v685_v49  ;;  %v695_v34 = vsel %vm688_vm4, %v685_v49, %v677_v12  ;;  %1013 = vperm.xlu1 %1574, %v1794_v3   ;;  %v690_v35 = vsel %vm688_vm4, %v675_v21, %v2033_v29  ;;  %v694_v52 = vsel %vm688_vm4, %v2033_v29, %v675_v21 }
 0x14e   : > { %v706_v5 = vmul.f32 %v2127_v51, %v694_v52  ;;  %v707_v20 = vmul.f32 %v2129_v30, %v690_v35 }
 0x150   : > { %v730_v16 = vmul.f32 %v1992_v55, %v706_v5  ;;  %v731_v63 = vmul.f32 %v1992_v55, %v707_v20  ;;  %v525_v5 = vmul.f32 %v1931_v27, %v1947_v38  ;;  %v526_v20 = vmul.f32 %v1931_v27, %v1944_v37 }
 0x152   : > { %v2147_v19 = vadd.f32 %v730_v16, %v666_v6  ;;  %v2149_v12 = vadd.f32 %v731_v63, %v667_v28 }
 0x153   : > { %861 = vperm.xlu2 %1573, %v1834_v17   ;;  %929 = vperm.xlu0 %1575, %v1843_v18  }
 0x154   : > { %v2153_v22 = vpop.permute.xlu0 %748  ;;  %v755_v49 = vpop.permute.xlu1 %754 }
 0x155   : > { %v542_v29 = vpop.permute.xlu2 %541  ;;  %896 = vrot.lane.b32.xlu1 %v1865_v48, %s1670_s20  ;;  %v2160_v21 = vsel %vm760_vm5, %v2068_v4, %v755_v49  ;;  %v2165_v55 = vsel %vm760_vm5, %v755_v49, %v2068_v4 }
 0x156   : > { %v549_v6 = vsel %vm545_vm2, %v534_v26, %v542_v29  ;;  %v553_v28 = vsel %vm545_vm2, %v542_v29, %v534_v26  ;;  %1576 = vset.pattern.permute.xlu1 %v1673_v47 }
 0x157   : > { %v566_v35 = vmul.f32 %v2006_v60, %v553_v28  ;;  %v567_v52 = vmul.f32 %v2008_v61, %v549_v6  ;;  %v637_v6 = vmul.f32 %v2029_v25, %v2106_v41 }
 0x159   : > { %v590_v4 = vmul.f32 %v1898_v11, %v566_v35  ;;  %v591_v16 = vmul.f32 %v1898_v11, %v567_v52 }
 0x15b   : > { %v598_v63 = vadd.f32 %v590_v4, %v525_v5  ;;  %v599_v26 = vadd.f32 %v591_v16, %v526_v20  ;;  %888 = vrot.lane.b32.xlu2 %v1862_v46, %s1670_s20  ;;  %1581 = vset.pattern.permute.xlu0 %v1674_v31 }
 0x15c   : > { %v829_v47 = vpop.permute.xlu0 %828  ;;  %v819_v49 = vpop.permute.xlu1 %818  ;;  %1001 = vperm.xlu0 %1581, %v1843_v18   ;;  %1577 = vset.pattern.permute.xlu2 %v1674_v31 }
 0x15d   : > { %v607_v27 = vpop.permute.xlu2 %606  ;;  %v2188_v37 = vsel %vm832_vm6, %v821_v45, %v829_v47  ;;  %v2192_v11 = vsel %vm832_vm6, %v829_v47, %v821_v45  ;;  %1036 = vrot.lane.b32.xlu1 %v1893_v8, %s1672_s11  ;;  %v2199_v38 = vsel %vm832_vm6, %v819_v49, %v2052_v62  ;;  %v2204_v29 = vsel %vm832_vm6, %v2052_v62, %v819_v49 }
 0x15e   : > { %v636_v45 = vmul.f32 %v2027_v23, %v2110_v42  ;;  %v708_v49 = vmul.f32 %v2127_v51, %v695_v34  ;;  %v661_v34 = vmul.f32 %v1923_v24, %v637_v6 }
 0x163   : > { %962 = vrot.lane.b32.xlu2 %v1872_v54, %s1671_s25 }
 0x164   : > { %v615_v28 = vpop.permute.xlu0 %614  ;;  %v540_v35 = vpop.permute.xlu1 %539  ;;  %1584 = vset.pattern.permute.xlu0 %v2637_v1  ;;  %v524_v1 = vmul.f32 %v1933_v33, %v1907_v13 }
 0x165   : > { %v687_v52 = vpop.permute.xlu2 %686  ;;  %v620_v5 = vsel %vm616_vm3, %v607_v27, %v615_v28  ;;  %v624_v62 = vsel %vm616_vm3, %v615_v28, %v607_v27  ;;  %933 = vperm.xlu1 %1576, %v1834_v17   ;;  %v548_v42 = vsel %vm545_vm2, %v2084_v9, %v540_v35  ;;  %v552_v41 = vsel %vm545_vm2, %v540_v35, %v2084_v9 }
 0x166   : > { %v638_v20 = vmul.f32 %v2027_v23, %v624_v62  ;;  %v639_v4 = vmul.f32 %v2029_v25, %v620_v5  ;;  %v564_v16 = vmul.f32 %v2006_v60, %v552_v41  ;;  %v565_v47 = vmul.f32 %v2008_v61, %v548_v42  ;;  %v1472_v23 = vld [vmem:[%s2631_s5 + $0x3] ss:$8 sm:$0x3] }
 0x167   : > { %v709_v27 = vmul.f32 %v2129_v30, %v691_v32  ;;  %v523_v28 = vmul.f32 %v1933_v33, %v1893_v8  ;;  %v660_v32 = vmul.f32 %v1923_v24, %v636_v45  ;;  %v2243_v62 = vperm.slane %v1472_v23, 0 }
 0x168   : > { %v662_v25 = vmul.f32 %v1915_v14, %v638_v20  ;;  %v663_v60 = vmul.f32 %v1915_v14, %v639_v4  ;;  %v588_v61 = vmul.f32 %v1941_v36, %v564_v16  ;;  %v589_v9 = vmul.f32 %v1941_v36, %v565_v47 }
 0x169   : > { %v2245_v42 = vperm.slane %v1472_v23, 1  ;;  %v732_v14 = vmul.f32 %v1979_v50, %v708_v49  ;;  %v733_v41 = vmul.f32 %v1979_v50, %v709_v27  ;;  %v1105_v27 = vld [vmem:[%s2630_s4 + $0x8] sm:$0xff] }
 0x16a   : > { %v670_v8 = vadd.f32 %v662_v25, %v598_v63  ;;  %v671_v35 = vadd.f32 %v663_v60, %v599_v26  ;;  %v596_v5 = vadd.f32 %v588_v61, %v523_v28  ;;  %v597_v33 = vadd.f32 %v589_v9, %v524_v1  ;;  %1115 = vperm.xlu0 %1584, %v1105_v27  }
 0x16b   : > { %1044 = vrot.lane.b32.xlu2 %v1907_v13, %s1672_s11  ;;  %v1675_v63 = vmov 8  }
 0x16c   : > { %v668_v36 = vadd.f32 %v660_v32, %v596_v5  ;;  %v669_v20 = vadd.f32 %v661_v34, %v597_v33  ;;  %v831_v45 = vpop.permute.xlu0 %830  ;;  %v757_v4 = vpop.permute.xlu1 %756 }
 0x16d   : > { %v759_v24 = vpop.permute.xlu2 %758  ;;  %1578 = vset.pattern.permute.xlu1 %v1675_v63  ;;  %v763_v1 = vsel %vm760_vm5, %v2153_v22, %v757_v4  ;;  %v767_v13 = vsel %vm760_vm5, %v757_v4, %v2153_v22 }
 0x16e   : > { %v780_v26 = vmul.f32 %v2243_v62, %v767_v13  ;;  %v781_v50 = vmul.f32 %v2245_v42, %v763_v1  ;;  %1085 = vperm.xlu1 %1578, %v1794_v3   ;;  %v740_v6 = vadd.f32 %v732_v14, %v668_v36  ;;  %v741_v16 = vadd.f32 %v733_v41, %v669_v20 }
 0x170   : > { %v804_v47 = vmul.f32 %v1967_v43, %v780_v26  ;;  %v805_v49 = vmul.f32 %v1967_v43, %v781_v50 }
 0x172   : > { %v812_v28 = vadd.f32 %v804_v47, %v740_v6  ;;  %v813_v23 = vadd.f32 %v805_v49, %v741_v16 }
 0x173   : > { %1009 = vperm.xlu2 %1577, %v1823_v15  }
 0x174   : > { %v2267_v22 = vpop.permute.xlu0 %892  ;;  %v679_v25 = vpop.permute.xlu1 %678 }
 0x175   : > { %v823_v60 = vpop.permute.xlu2 %822  ;;  %v692_v3 = vsel %vm688_vm4, %v679_v25, %v687_v52  ;;  %v696_v61 = vsel %vm688_vm4, %v687_v52, %v679_v25  ;;  %v1473_v52 = vld [vmem:[%s2631_s5 + $0x5] ss:$8 sm:$0x3] }
 0x176   : > { %v836_v43 = vsel %vm832_vm6, %v823_v60, %v831_v45  ;;  %v840_v9 = vsel %vm832_vm6, %v831_v45, %v823_v60  ;;  %v710_v32 = vmul.f32 %v2127_v51, %v696_v61  ;;  %v711_v34 = vmul.f32 %v2129_v30, %v692_v3  ;;  %1034 = vrot.lane.b32.xlu1 %v1872_v54, %s1672_s11 }
 0x177   : > { %1579 = vset.pattern.permute.xlu1 %v1674_v31  ;;  %v2289_v36 = vperm.slane %v1473_v52, 0  ;;  %v2291_v20 = vperm.slane %v1473_v52, 1 }
 0x178   : > { %v734_v5 = vmul.f32 %v1969_v44, %v710_v32  ;;  %v735_v33 = vmul.f32 %v1969_v44, %v711_v34 }
 0x179   : > { %v852_v49 = vmul.f32 %v2289_v36, %v2188_v37  ;;  %v853_v27 = vmul.f32 %v2291_v20, %v2192_v11 }
 0x17a   : > { %v742_v14 = vadd.f32 %v734_v5, %v670_v8  ;;  %v743_v41 = vadd.f32 %v735_v33, %v671_v35  ;;  %v854_v8 = vmul.f32 %v2289_v36, %v836_v43  ;;  %v855_v35 = vmul.f32 %v2291_v20, %v840_v9 }
 0x17b   : > { %960 = vrot.lane.b32.xlu2 %v1862_v46, %s1671_s25  ;;  %v778_v5 = vmul.f32 %v2243_v62, %v2165_v55  ;;  %v779_v33 = vmul.f32 %v2245_v42, %v2160_v21  ;;  %v704_v21 = vmul.f32 %v2127_v51, %v2060_v2  ;;  %s1388_s25 = sshll.u32 %s1385_s29, 4  ;;  %s1389_s25 = int_to_ptr.hbm [resolvable:$true] %s1388_s25 }
 0x17c   : > { %v975_v54 = vpop.permute.xlu0 %974  ;;  %v751_v45 = vpop.permute.xlu1 %750  ;;  %1580 = vset.pattern.permute.xlu2 %v1675_v63  ;;  %v878_v6 = vmul.f32 %v2003_v59, %v854_v8  ;;  %v1107_v8 = vld [vmem:[%s2630_s4 + $0x18] sm:$0xff]  ;;  %s1608_s17 = sshra.s32 %s1389_s25, 4  ;;  %s1609_s17 = int_to_ptr.hbm [resolvable:$true] %s1608_s17 }
 0x17d   : > { %v903_v31 = vpop.permute.xlu2 %902  ;;  %v764_v44 = vsel %vm760_vm5, %v751_v45, %v759_v24  ;;  %v768_v4 = vsel %vm760_vm5, %v759_v24, %v751_v45  ;;  %v879_v24 = vmul.f32 %v2003_v59, %v855_v35  ;;  %s1610_s30 = scalar_lea.hbm %s1609_s17, 32  ;;  %p1615_p0 = scmp.lt.s32.totalorder %s1609_s17, %s2636_s10 }
 0x17e   : > { %v782_v1 = vmul.f32 %v2243_v62, %v768_v4  ;;  %v783_v13 = vmul.f32 %v2245_v42, %v764_v44  ;;  %1005 = vperm.xlu1 %1579, %v1834_v17   ;;  %p1611_p11 = scmp.ne.s32.totalorder %s1609_s17, %s1610_s30  ;;  %p1616_p1 = scmp.lt.s32.totalorder %s1614_s28, %s1610_s30 }
 0x180   : > { %v806_v26 = vmul.f32 %v1949_v40, %v782_v1  ;;  %v807_v50 = vmul.f32 %v1949_v40, %v783_v13  ;;  %p1612_p12 = pnand %p1611_p11, %p1771_p5  ;;  %p1617_p2 = por %p1616_p1, %p1615_p0 }
 0x182   : > { %v814_v16 = vadd.f32 %v806_v26, %v742_v14  ;;  %v815_v47 = vadd.f32 %v807_v50, %v743_v41  ;;  %p1613_p13 = pneg %p1612_p12 }
 0x183   : > { %1042 = vrot.lane.b32.xlu2 %v1896_v10, %s1672_s11 }
 0x184   : > { %v866_v40 = vpop.permute.xlu0 %865  ;;  %v895_v25 = vpop.permute.xlu1 %894  ;;  %v886_v60 = vadd.f32 %v878_v6, %v814_v16  ;;  %v887_v3 = vadd.f32 %v879_v24, %v815_v47  ;;  %v1106_v16 = vld [vmem:[%s2630_s4 + $0x10] sm:$0xff]  ;;  %p1618_p3 = pnand %p1617_p2, %p1613_p13 }
 0x185   : > { %v967_v61 = vpop.permute.xlu2 %966  ;;  %v876_v43 = vmul.f32 %v866_v40, %v852_v49  ;;  %v877_v59 = vmul.f32 %v866_v40, %v853_v27  ;;  %v908_v9 = vsel %vm904_vm7, %v895_v25, %v903_v31  ;;  %v912_v37 = vsel %vm904_vm7, %v903_v31, %v895_v25 }
 0x186   : > { %v2321_v11 = vsel %vm976_vm8, %v967_v61, %v975_v54  ;;  %v2325_v10 = vsel %vm976_vm8, %v975_v54, %v967_v61  ;;  %1032 = vrot.lane.b32.xlu1 %v1862_v46, %s1672_s11  ;;  %v705_v54 = vmul.f32 %v2129_v30, %v2056_v0  ;;  %v2644_v31 = vmov 0  }
 0x187   : > { %v2329_v32 = vadd.f32 %v876_v43, %v812_v28  ;;  %v2331_v34 = vadd.f32 %v877_v59, %v813_v23  ;;  %1582 = vset.pattern.permute.xlu1 %v1675_v63 }
 0x18b   : > { %1081 = vperm.xlu2 %1580, %v1823_v15  }
 0x18c   : > { %v825_v52 = vpop.permute.xlu0 %824  ;;  %v901_v14 = vpop.permute.xlu1 %900 }
 0x18d   : > { %v790_v41 = vpop.permute.xlu2 %789  ;;  %v907_v46 = vsel %vm904_vm7, %v2267_v22, %v901_v14  ;;  %v911_v28 = vsel %vm904_vm7, %v901_v14, %v2267_v22 }
 0x18e   : > { %v802_v63 = vmul.f32 %v790_v41, %v778_v5  ;;  %v803_v23 = vmul.f32 %v790_v41, %v779_v33  ;;  %1077 = vperm.xlu1 %1582, %v1834_v17   ;;  %v1474_v17 = vld [vmem:[%s2631_s5 + $0x6] ss:$8 sm:$0x3]  ;;  %v776_v41 = vmul.f32 %v2243_v62, %v2077_v7 }
 0x18f   : > { %v2367_v30 = vperm.slane %v1474_v17, 0  ;;  %v2369_v4 = vperm.slane %v1474_v17, 1 }
 0x190   : > { %v810_v15 = vadd.f32 %v802_v63, %v2147_v19  ;;  %v811_v55 = vadd.f32 %v803_v23, %v2149_v12 }
 0x191   : > { %v926_v35 = vmul.f32 %v2367_v30, %v908_v9  ;;  %v927_v1 = vmul.f32 %v2369_v4, %v912_v37  ;;  %v925_v14 = vmul.f32 %v2369_v4, %v911_v28 }
 0x193   : > { %1040 = vrot.lane.b32.xlu2 %v1865_v48, %s1672_s11  ;;  %s1455_s11 = sshll.u32 %s350_s18, 5 }
 0x194   : > { %v2354_v45 = vpop.permute.xlu0 %964  ;;  %v714_v22 = vpop.permute.xlu1 %713  ;;  %1583 = vset.pattern.permute.xlu2 %v2644_v31  ;;  %s352_s20 = scalar_lea.vmem [#allocation2], %s1455_s11  ;;  %s1374_s11 = scalar_lea.sflag [#allocation3], %s350_s18 }
 0x195   : > { %v817_v19 = vpop.permute.xlu2 %816  ;;  %v728_v12 = vmul.f32 %v714_v22, %v704_v21  ;;  %v729_v44 = vmul.f32 %v714_v22, %v705_v54  ;;  %s1386_s12 = sshll.u32 %s352_s20, 4  ;;  %s1387_s12 = int_to_ptr.vmem [resolvable:$true] %s1386_s12 }
 0x196   : > { %v833_v2 = vsel %vm832_vm6, %v817_v19, %v825_v52  ;;  %v837_v0 = vsel %vm832_vm6, %v825_v52, %v817_v19  ;;  %1073 = vperm.xlu1 %1582, %v1843_v18   ;;  %v1104_v18 = vld [vmem:[%s2630_s4] sm:$0xff]  ;;  %v924_v52 = vmul.f32 %v2367_v30, %v907_v46 }
 0x197   : > { %v736_v48 = vadd.f32 %v728_v12, %v2047_v58  ;;  %v737_v51 = vadd.f32 %v729_v44, %v2045_v53  ;;  %v849_v46 = vmul.f32 %v2291_v20, %v837_v0 }
 0x19b   : > { %1125 = vperm.xlu2 %1583, %v1107_v8  }
 0x19c   : > { %v2376_v13 = vpop.permute.xlu0 %1046 }
 0x19d   : > { %v899_v53 = vpop.permute.xlu2 %898  ;;  %v942_v58 = vpop.permute.xlu1 %941 }
 0x19e   : > { %1585 = vset.pattern.permute.xlu1 %v2644_v31  ;;  %v950_v26 = vmul.f32 %v942_v58, %v926_v35  ;;  %v951_v50 = vmul.f32 %v942_v58, %v927_v1 }
 0x19f   : > { %1110 = vperm.xlu1 %1585, %v1104_v18  }
 0x1a0   : > { %v958_v6 = vadd.f32 %v950_v26, %v886_v60  ;;  %v959_v24 = vadd.f32 %v951_v50, %v887_v3  ;;  %v850_v60 = vmul.f32 %v2289_v36, %v2199_v38  ;;  %v851_v3 = vmul.f32 %v2291_v20, %v2204_v29 }
 0x1a1   : > { %v777_v38 = vmul.f32 %v2245_v42, %v2073_v56 }
 0x1a3   : > { %1120 = vperm.xlu2 %1583, %v1106_v16  }
 0x1a4   : > { %v2385_v47 = vpop.permute.xlu0 %970 }
 0x1a5   : > { %v2387_v49 = vpop.permute.xlu2 %1038  ;;  %v891_v27 = vpop.permute.xlu1 %890 }
 0x1a6   : > { %v2391_v40 = vsel %vm904_vm7, %v891_v27, %v899_v53  ;;  %v2395_v25 = vsel %vm904_vm7, %v899_v53, %v891_v27 }
 0x1ac   : > { %v858_v61 = vpop.permute.xlu0 %857 }
 0x1ad   : > { %v862_v43 = vpop.permute.xlu2 %861  ;;  %v973_v59 = vpop.permute.xlu1 %972  ;;  %v873_v42 = vmul.f32 %v858_v61, %v849_v46 }
 0x1ae   : > { %v874_v9 = vmul.f32 %v862_v43, %v850_v60  ;;  %v875_v37 = vmul.f32 %v862_v43, %v851_v3 }
 0x1b0   : > { %v2401_v5 = vadd.f32 %v874_v9, %v810_v15  ;;  %v2403_v33 = vadd.f32 %v875_v37, %v811_v55  ;;  %v1475_v15 = vld [vmem:[%s2631_s5 + $0x7] ss:$8 sm:$0x3]  ;;  %v848_v55 = vmul.f32 %v2289_v36, %v833_v2 }
 0x1b1   : > { %v2418_v19 = vperm.slane %v1475_v15, 0  ;;  %v2420_v12 = vperm.slane %v1475_v15, 1 }
 0x1b2   : > { %v872_v56 = vmul.f32 %v858_v61, %v848_v55 }
 0x1b3   : > { %v998_v36 = vmul.f32 %v2418_v19, %v2321_v11  ;;  %v999_v20 = vmul.f32 %v2420_v12, %v2325_v10  ;;  %v979_v11 = vsel %vm976_vm8, %v2354_v45, %v973_v59  ;;  %v983_v10 = vsel %vm976_vm8, %v973_v59, %v2354_v45 }
 0x1b4   : > { %v996_v27 = vmul.f32 %v2418_v19, %v979_v11  ;;  %v997_v60 = vmul.f32 %v2420_v12, %v983_v10 }
 0x1b5   : > { %v889_v29 = vpop.permute.xlu2 %888  ;;  %v938_v63 = vpop.permute.xlu0 %937 }
 0x1b6   : > { %v948_v23 = vmul.f32 %v938_v63, %v924_v52  ;;  %v949_v21 = vmul.f32 %v938_v63, %v925_v14  ;;  %v786_v54 = vpop.permute.xlu1 %785  ;;  %v1476_v63 = vld [vmem:[%s2631_s5 + $0x10] ss:$8 sm:$0x3] }
 0x1b7   : > { %v800_v28 = vmul.f32 %v786_v54, %v776_v41  ;;  %v801_v22 = vmul.f32 %v786_v54, %v777_v38  ;;  %v922_v41 = vmul.f32 %v2367_v30, %v2391_v40  ;;  %v923_v38 = vmul.f32 %v2369_v4, %v2395_v25 }
 0x1b8   : > { %v956_v7 = vadd.f32 %v948_v23, %v2329_v32  ;;  %v957_v62 = vadd.f32 %v949_v21, %v2331_v34  ;;  %v2460_v55 = vperm.slane %v1476_v63, 0  ;;  %v2462_v46 = vperm.slane %v1476_v63, 1 }
 0x1b9   : > { %v808_v31 = vadd.f32 %v800_v28, %v736_v48  ;;  %v809_v17 = vadd.f32 %v801_v22, %v737_v51 }
 0x1bb   : > { %v880_v44 = vadd.f32 %v872_v56, %v808_v31  ;;  %v881_v8 = vadd.f32 %v873_v42, %v809_v17 }
 0x1bd   : > { %v2422_v35 = vpop.permute.xlu2 %962  ;;  %v2428_v34 = vpop.permute.xlu0 %968 }
 0x1bf   : > { %v1014_v32 = vpop.permute.xlu1 %1013 }
 0x1c0   : > { %v1022_v2 = vmul.f32 %v1014_v32, %v998_v36  ;;  %v1023_v0 = vmul.f32 %v1014_v32, %v999_v20 }
 0x1c2   : > { %v1030_v48 = vadd.f32 %v1022_v2, %v958_v6  ;;  %v1031_v51 = vadd.f32 %v1023_v0, %v959_v24  ;;  %v978_v2 = vsel %vm976_vm8, %v2422_v35, %v2385_v47  ;;  %v982_v0 = vsel %vm976_vm8, %v2385_v47, %v2422_v35 }
 0x1c5   : > { %v1045_v1 = vpop.permute.xlu2 %1044  ;;  %v930_v26 = vpop.permute.xlu0 %929 }
 0x1c7   : > { %v897_v18 = vpop.permute.xlu1 %896 }
 0x1c8   : > { %v905_v53 = vsel %vm904_vm7, %v889_v29, %v897_v18  ;;  %v909_v58 = vsel %vm904_vm7, %v897_v18, %v889_v29 }
 0x1c9   : > { %v920_v50 = vmul.f32 %v2367_v30, %v905_v53  ;;  %v921_v6 = vmul.f32 %v2369_v4, %v909_v58  ;;  %v1052_v30 = vsel %vm1048_vm9, %v2387_v49, %v2376_v13  ;;  %v1056_v4 = vsel %vm1048_vm9, %v2376_v13, %v2387_v49 }
 0x1ca   : > { %v1070_v25 = vmul.f32 %v2460_v55, %v1052_v30  ;;  %v994_v58 = vmul.f32 %v2418_v19, %v978_v2 }
 0x1cb   : > { %v944_v24 = vmul.f32 %v930_v26, %v920_v50  ;;  %v945_v16 = vmul.f32 %v930_v26, %v921_v6  ;;  %v995_v26 = vmul.f32 %v2420_v12, %v982_v0 }
 0x1cd   : > { %v2444_v3 = vadd.f32 %v944_v24, %v880_v44  ;;  %v2446_v61 = vadd.f32 %v945_v16, %v881_v8  ;;  %v1010_v43 = vpop.permute.xlu2 %1009 }
 0x1ce   : > { %v1020_v9 = vmul.f32 %v1010_v43, %v996_v27  ;;  %v1021_v37 = vmul.f32 %v1010_v43, %v997_v60  ;;  %v1002_v53 = vpop.permute.xlu0 %1001 }
 0x1cf   : > { %v1037_v52 = vpop.permute.xlu1 %1036 }
 0x1d0   : > { %v1028_v14 = vadd.f32 %v1020_v9, %v956_v7  ;;  %v1029_v45 = vadd.f32 %v1021_v37, %v957_v62  ;;  %v1051_v44 = vsel %vm1048_vm9, %v1037_v52, %v1045_v1  ;;  %v1055_v13 = vsel %vm1048_vm9, %v1045_v1, %v1037_v52 }
 0x1d1   : > { %v1068_v8 = vmul.f32 %v2460_v55, %v1051_v44  ;;  %v1069_v36 = vmul.f32 %v2462_v46, %v1055_v13 }
 0x1d5   : > { %v2448_v59 = vpop.permute.xlu2 %960 }
 0x1d6   : > { %v981_v63 = vsel %vm976_vm8, %v2428_v34, %v2448_v59 }
 0x1d7   : > { %v934_v29 = vpop.permute.xlu1 %933 }
 0x1d8   : > { %v946_v23 = vmul.f32 %v934_v29, %v922_v41  ;;  %v947_v21 = vmul.f32 %v934_v29, %v923_v38  ;;  %v977_v29 = vsel %vm976_vm8, %v2448_v59, %v2428_v34 }
 0x1da   : > { %v954_v54 = vadd.f32 %v946_v23, %v2401_v5  ;;  %v955_v15 = vadd.f32 %v947_v21, %v2403_v33  ;;  %v1071_v5 = vmul.f32 %v2462_v46, %v1056_v4  ;;  %v993_v4 = vmul.f32 %v2420_v12, %v981_v63 }
 0x1dd   : > { %v1043_v40 = vpop.permute.xlu2 %1042 }
 0x1e0   : > { %v1086_v33 = vpop.permute.xlu1 %1085 }
 0x1e1   : > { %v1094_v28 = vmul.f32 %v1086_v33, %v1070_v25  ;;  %v1095_v22 = vmul.f32 %v1086_v33, %v1071_v5  ;;  %v1017_v33 = vmul.f32 %v1002_v53, %v993_v4 }
 0x1e3   : > { %v1102_v7 = vadd.f32 %v1094_v28, %v1030_v48  ;;  %v1103_v62 = vadd.f32 %v1095_v22, %v1031_v51 }
 0x1e5   : > { %v1082_v56 = vpop.permute.xlu2 %1081 }
 0x1e6   : > { %v1092_v48 = vmul.f32 %v1082_v56, %v1068_v8  ;;  %v1093_v51 = vmul.f32 %v1082_v56, %v1069_v36 }
 0x1e8   : > { %v1035_v42 = vpop.permute.xlu1 %1034  ;;  %v1100_v50 = vadd.f32 %v1092_v48, %v1028_v14  ;;  %v1101_v47 = vadd.f32 %v1093_v51, %v1029_v45  ;;  %v1116_v45 = vpop.permute.xlu0 %1115 }
 0x1e9   : > { %v1050_v11 = vsel %vm1048_vm9, %v1035_v42, %v1043_v40  ;;  %v1054_v10 = vsel %vm1048_vm9, %v1043_v40, %v1035_v42 }
 0x1ea   : > { %v1066_v60 = vmul.f32 %v2460_v55, %v1050_v11  ;;  %v1067_v43 = vmul.f32 %v2462_v46, %v1054_v10  ;;  %v1185_v10 = vld [vmem:[%s2633_s7] sm:$0xff] }
 0x1ed   : > { %v1041_v31 = vpop.permute.xlu2 %1040 }
 0x1f0   : > { %v1006_v17 = vpop.permute.xlu1 %1005 }
 0x1f1   : > { %v1018_v35 = vmul.f32 %v1006_v17, %v994_v58  ;;  %v1019_v6 = vmul.f32 %v1006_v17, %v995_v26  ;;  %v1159_v58 = vld [vmem:[%s2632_s6] sm:$0xff] }
 0x1f3   : > { %v1026_v52 = vadd.f32 %v1018_v35, %v954_v54  ;;  %v1027_v41 = vadd.f32 %v1019_v6, %v955_v15  ;;  %v992_v15 = vmul.f32 %v2418_v19, %v977_v29  ;;  %v1188_v35 = vld [vmem:[%s2633_s7 + $0x18] sm:$0xff] }
 0x1f5   : > { %v1126_v49 = vpop.permute.xlu2 %1125  ;;  %v1016_v59 = vmul.f32 %v1002_v53, %v992_v15 }
 0x1f6   : > { %v2480_v20 = vadd.f32 %v1126_v49, %v1102_v7  ;;  %v2482_v32 = vadd.f32 %v1126_v49, %v1103_v62  ;;  %v1025_v62 = vadd.f32 %v1017_v33, %v2446_v61 }
 0x1f7   : > { %v1024_v12 = vadd.f32 %v1016_v59, %v2444_v3  ;;  %v1317_v59 = vld [vmem:[%s2635_s9] sm:$0xff] }
 0x1f8   : > { %v1033_v1 = vpop.permute.xlu1 %1032  ;;  %v1145_v18 = vadd.f32 %v2482_v32, %v2480_v20 }
 0x1f9   : > { %v1049_v40 = vsel %vm1048_vm9, %v1033_v1, %v1041_v31  ;;  %v1053_v25 = vsel %vm1048_vm9, %v1041_v31, %v1033_v1 }
 0x1fa   : > { %1146 = vadd.xlane.f32.xlu2 %v1145_v18  ;;  %v1064_v28 = vmul.f32 %v2460_v55, %v1049_v40  ;;  %v1065_v22 = vmul.f32 %v2462_v46, %v1053_v25  ;;  %v1676_v55 = vmov 256.0  }
 0x1fb   : > { %1588 = vrcp.f32 %v1676_v55 }
 0x1fd   : > { %v1121_v24 = vpop.permute.xlu2 %1120 }
 0x1fe   : > { %v2500_v16 = vadd.f32 %v1121_v24, %v1100_v50  ;;  %v2502_v27 = vadd.f32 %v1121_v24, %v1101_v47  ;;  %v1186_v50 = vld [vmem:[%s2633_s7 + $0x8] sm:$0xff]  ;;  %v1187_v47 = vld [vmem:[%s2633_s7 + $0x10] sm:$0xff] }
 0x200   : > { %v1078_v9 = vpop.permute.xlu1 %1077  ;;  %v1142_v37 = vadd.f32 %v2502_v27, %v2500_v16 }
 0x201   : > { %v1090_v38 = vmul.f32 %v1078_v9, %v1066_v60  ;;  %v1091_v14 = vmul.f32 %v1078_v9, %v1067_v43  ;;  %v1589_v46 = vpop.eup %1588 }
 0x202   : > { %1143 = vadd.xlane.f32.xlu1 %v1142_v37  ;;  %v1149_v13 = vmul.f32 256.0, %v1589_v46  ;;  %vm1153_vm10 = vweird.f32 %v1589_v46 }
 0x203   : > { %v1098_v23 = vadd.f32 %v1090_v38, %v1026_v52  ;;  %v1099_v21 = vadd.f32 %v1091_v14, %v1027_v41  ;;  %v1318_v52 = vld [vmem:[%s2635_s9 + $0x8] sm:$0xff] }
 0x204   : > { %v1150_v49 = vsub.f32 1.0, %v1149_v13 }
 0x205   : > { %v2516_v30 = vadd.f32 %v1116_v45, %v1098_v23  ;;  %v2518_v54 = vadd.f32 %v1116_v45, %v1099_v21 }
 0x206   : > { %v1151_v8 = vmul.f32 %v1589_v46, %v1150_v49 }
 0x207   : > { %v1139_v5 = vadd.f32 %v2518_v54, %v2516_v30 }
 0x208   : > { %v1074_v34 = vpop.permute.xlu1 %1073  ;;  %v1152_v3 = vadd.f32 %v1589_v46, %v1151_v8 }
 0x209   : > { %1140 = vadd.xlane.f32.xlu0 %v1139_v5  ;;  %v1088_v19 = vmul.f32 %v1074_v34, %v1064_v28  ;;  %v1089_v7 = vmul.f32 %v1074_v34, %v1065_v22 }
 0x20a   : > { %v1154_v61 = vsel %vm1153_vm10, %v1589_v46, %v1152_v3 }
 0x20b   : > { %v1097_v56 = vadd.f32 %v1089_v7, %v1025_v62  ;;  %v1096_v57 = vadd.f32 %v1088_v19, %v1024_v12 }
 0x211   : > { %v1111_v42 = vpop.permute.xlu1 %1110 }
 0x212   : > { %v2532_v31 = vadd.f32 %v1111_v42, %v1096_v57  ;;  %v2534_v17 = vadd.f32 %v1111_v42, %v1097_v56 }
 0x214   : > { %v1136_v44 = vadd.f32 %v2534_v17, %v2532_v31 }
 0x216   : > { %1137 = vadd.xlane.f32.xlu2 %v1136_v44 }
 0x26d   : > { %v1147_v36 = vpop.xlane.xlu2 %1146 }
 0x26e   : > { %v1158_v2 = vmul.f32 %v1154_v61, %v1147_v36 }
 0x270   : > { %1176 = vmatpush.msra.mxu2 %v1158_v2 }
 0x275   : > { %v1144_v0 = vpop.xlane.xlu1 %1143 }
 0x276   : > { %v1157_v48 = vmul.f32 %v1154_v61, %v1144_v0 }
 0x278   : > { %1177 = vmatpush.msra.mxu2 %v1157_v48 }
 0x27c   : > { %v1141_v51 = vpop.xlane.xlu0 %1140 }
 0x27d   : > { %v1156_v1 = vmul.f32 %v1154_v61, %v1141_v51 }
 0x27f   : > { %1178 = vmatpush.msra.mxu2 %v1156_v1 }
 0x289   : > { %v1138_v18 = vpop.xlane.xlu2 %1137 }
 0x28a   : > { %v1155_v53 = vmul.f32 %v1154_v61, %v1138_v18 }
 0x28c   : > { %1179 = vmatpush.msra.mxu2 %v1155_v53 }
 0x28d   : > { %1477 = vmatmul.msk.f32.vlgmr.msra.gmra.mxu2 %vm1160_vm11, %v1159_v58 }
 0x310   : > { %v1181_v26 = vpop.f32.mrf.mxu2 }
 0x311   : > { %v1184_v11 = vmax.f32 %v1181_v26, 0.0 }
 0x313   : > { %1217 = vmatpush.msra.mxu3 %v1184_v11 }
 0x314   : > { %1478 = vmatmul.msk.f32.vlgmr.msra.gmra.mxu3 %vm1189_vm12, %v1185_v10 }
 0x31c   : > { %1479 = vmatmul.msk.f32.gmra.mxu3 %vm1189_vm12, %v1186_v50 }
 0x324   : > { %1480 = vmatmul.msk.f32.gmra.mxu3 %vm1189_vm12, %v1187_v47 }
 0x32c   : > { %1481 = vmatmul.msk.f32.gmra.mxu3 %vm1189_vm12, %v1188_v35 }
 0x397   : > { %v1219_v6 = vpop.f32.mrf.mxu3 }
 0x398   : > { %v1220_v24 = vadd.f32 3.0, %v1219_v6 }
 0x39a   : > { %v1231_v60 = vmax.f32 %v1220_v24, 0.0 }
 0x39c   : > { %v1235_v43 = vmin.f32 %v1231_v60, 6.0 }
 0x39e   : > { %v1239_v9 = vmul.f32 %v1235_v43, %v1859_v39 }
 0x39f   : > { %v1222_v37 = vpop.f32.mrf.mxu3 }
 0x3a0   : > { %1245 = vperm.xlu0 %1584, %v1239_v9   ;;  %v1223_v14 = vadd.f32 3.0, %v1222_v37 }
 0x3a2   : > { %v1232_v63 = vmax.f32 %v1223_v14, 0.0 }
 0x3a4   : > { %v1236_v4 = vmin.f32 %v1232_v63, 6.0 }
 0x3a6   : > { %v1240_v5 = vmul.f32 %v1236_v4, %v1859_v39 }
 0x3a7   : > { %v1225_v41 = vpop.f32.mrf.mxu3 }
 0x3a8   : > { %v1226_v38 = vadd.f32 3.0, %v1225_v41  ;;  %1326 = vperm.xlu0 %1584, %v1318_v52  }
 0x3aa   : > { %v1233_v45 = vmax.f32 %v1226_v38, 0.0 }
 0x3ac   : > { %v1237_v29 = vmin.f32 %v1233_v45, 6.0 }
 0x3ae   : > { %v1241_v23 = vmul.f32 %v1237_v29, %v1859_v39 }
 0x3af   : > { %v1228_v21 = vpop.f32.mrf.mxu3 }
 0x3b0   : > { %v1229_v15 = vadd.f32 3.0, %v1228_v21  ;;  %1255 = vperm.xlu2 %1583, %v1241_v23   ;;  %v1496_v21 = vld [vmem:[%s2634_s8] sm:$0xff] }
 0x3b2   : > { %v1234_v40 = vmax.f32 %v1229_v15, 0.0 }
 0x3b4   : > { %v1238_v25 = vmin.f32 %v1234_v40, 6.0 }
 0x3b6   : > { %v1242_v34 = vmul.f32 %v1238_v25, %v1859_v39  ;;  %v1590_v25 = vld [vmem:[%s1801_s21] sm:$0xff] }
 0x3b8   : > { %1260 = vperm.xlu1 %1585, %v1242_v34   ;;  %1250 = vperm.xlu2 %1583, %v1240_v5  }
 0x3c0   : > { %1321 = vperm.xlu1 %1585, %v1317_v59  }
 0x40a   : > { %v1256_v33 = vpop.permute.xlu2 %1255 }
 0x40b   : > { %v1267_v19 = vmul.f32 %v1256_v33, %v2500_v16  ;;  %v1268_v56 = vmul.f32 %v1256_v33, %v2502_v27 }
 0x40d   : > { %v1275_v62 = vadd.f32 3.0, %v1267_v19  ;;  %v1276_v13 = vadd.f32 3.0, %v1268_v56 }
 0x40f   : > { %v1283_v46 = vmax.f32 %v1275_v62, 0.0  ;;  %v1284_v0 = vmax.f32 %v1276_v13, 0.0 }
 0x411   : > { %v1291_v36 = vmin.f32 %v1283_v46, 6.0  ;;  %v1292_v11 = vmin.f32 %v1284_v0, 6.0 }
 0x412   : > { %v1251_v28 = vpop.permute.xlu2 %1250  ;;  %v1246_v22 = vpop.permute.xlu0 %1245 }
 0x413   : > { %v1265_v7 = vmul.f32 %v1251_v28, %v2516_v30  ;;  %v1263_v12 = vmul.f32 %v1246_v22, %v2532_v31  ;;  %v1266_v44 = vmul.f32 %v1251_v28, %v2518_v54  ;;  %v1264_v55 = vmul.f32 %v1246_v22, %v2534_v17  ;;  %v1591_v28 = vld [vmem:[%s1801_s21 + $0x10] sm:$0xff] }
 0x414   : > { %v1299_v53 = vmul.f32 %v1291_v36, %v1267_v19  ;;  %v1300_v60 = vmul.f32 %v1292_v11, %v1268_v56 }
 0x415   : > { %v1273_v57 = vadd.f32 3.0, %v1265_v7  ;;  %v1271_v42 = vadd.f32 3.0, %v1263_v12  ;;  %v1274_v61 = vadd.f32 3.0, %v1266_v44  ;;  %v1272_v31 = vadd.f32 3.0, %v1264_v55 }
 0x416   : > { %v1307_v6 = vmul.f32 %v1299_v53, %v1859_v39  ;;  %v1308_v14 = vmul.f32 %v1300_v60, %v1859_v39 }
 0x417   : > { %v1281_v8 = vmax.f32 %v1273_v57, 0.0  ;;  %v1279_v3 = vmax.f32 %v1271_v42, 0.0  ;;  %v1282_v17 = vmax.f32 %v1274_v61, 0.0  ;;  %v1280_v18 = vmax.f32 %v1272_v31, 0.0  ;;  %v1593_v42 = vld [vmem:[%s1801_s21 + $0x18] sm:$0xff] }
 0x419   : > { %v1289_v48 = vmin.f32 %v1281_v8, 6.0  ;;  %v1287_v51 = vmin.f32 %v1279_v3, 6.0  ;;  %v1288_v47 = vmin.f32 %v1280_v18, 6.0 }
 0x41a   : > { %v1327_v34 = vpop.permute.xlu0 %1326 }
 0x41b   : > { %v1297_v10 = vmul.f32 %v1289_v48, %v1265_v7  ;;  %v1296_v41 = vmul.f32 %v1288_v47, %v1264_v55 }
 0x41d   : > { %v1305_v37 = vmul.f32 %v1297_v10, %v1859_v39  ;;  %v1304_v63 = vmul.f32 %v1296_v41, %v1859_v39 }
 0x42a   : > { %v1261_v49 = vpop.permute.xlu1 %1260 }
 0x42b   : > { %v1269_v16 = vmul.f32 %v1261_v49, %v2480_v20  ;;  %v1270_v30 = vmul.f32 %v1261_v49, %v2482_v32  ;;  %v1295_v20 = vmul.f32 %v1287_v51, %v1263_v12  ;;  %v1290_v32 = vmin.f32 %v1282_v17, 6.0  ;;  %v1592_v12 = vld [vmem:[%s1801_s21 + $0x8] sm:$0xff] }
 0x42d   : > { %v1277_v2 = vadd.f32 3.0, %v1269_v16  ;;  %v1278_v27 = vadd.f32 3.0, %v1270_v30  ;;  %v1303_v9 = vmul.f32 %v1295_v20, %v1859_v39  ;;  %v1298_v52 = vmul.f32 %v1290_v32, %v1266_v44 }
 0x42f   : > { %v1285_v54 = vmax.f32 %v1277_v2, 0.0  ;;  %v1286_v1 = vmax.f32 %v1278_v27, 0.0  ;;  %v1313_v45 = vpack.c.bf16 %v1305_v37, %v1303_v9  ;;  %v1306_v29 = vmul.f32 %v1298_v52, %v1859_v39 }
 0x431   : > { %v1293_v58 = vmin.f32 %v1285_v54, 6.0  ;;  %v1294_v26 = vmin.f32 %v1286_v1, 6.0  ;;  %v1314_v15 = vpack.c.bf16 %v1306_v29, %v1304_v63 }
 0x432   : > { %v1322_v4 = vpop.permute.xlu1 %1321 }
 0x433   : > { %v1301_v50 = vmul.f32 %v1293_v58, %v1269_v16  ;;  %v1302_v35 = vmul.f32 %v1294_v26, %v1270_v30 }
 0x435   : > { %v1309_v24 = vmul.f32 %v1301_v50, %v1859_v39  ;;  %v1310_v38 = vmul.f32 %v1302_v35, %v1859_v39 }
 0x437   : > { %v1315_v43 = vpack.c.bf16 %v1309_v24, %v1307_v6  ;;  %v1316_v23 = vpack.c.bf16 %v1310_v38, %v1308_v14 }
 0x439   : > { %1343 = vmatpush.bf16.msrb.mxu2 %v1315_v43 }
 0x43d   : > { %1344 = vmatpush.bf16.msrb.mxu2 %v1313_v45 }
 0x440   : > { %1486 = vmatmul.msk.bf16.vlgmr.msrb.gmra.mxu2 %vm1160_vm11, %v1496_v21 }
 0x441   : > { %1357 = vmatpush.bf16.msra.mxu2 %v1316_v23 }
 0x445   : > { %1358 = vmatpush.bf16.msra.mxu2 %v1314_v15 }
 0x450   : > { %1487 = vmatmul.msk.bf16.vlgmr.msra.gmra.mxu2 %vm1160_vm11, %v1496_v21 }
 0x4c3   : > { %v1346_v39 = vpop.f32.mrf.mxu2 }
 0x4c4   : > { %v1347_v40 = vadd.f32 %v1346_v39, %v1322_v4 }
 0x4c6   : > { %v1365_v5 = vadd.f32 %v1590_v25, %v1347_v40 }
 0x4c8   : > { %1369 = vst [vmem:[%s352_s20] sm:$0xff] %v1365_v5 }
 0x4cb   : > { %v1348_v59 = vpop.f32.mrf.mxu2 }
 0x4cc   : > { %v1349_v33 = vadd.f32 %v1348_v59, %v1327_v34 }
 0x4ce   : > { %v1367_v22 = vadd.f32 %v1591_v28, %v1349_v33 }
 0x4d0   : > { %1371 = vst [vmem:[%s352_s20 + $0x10] sm:$0xff] %v1367_v22 }
 0x4d3   : > { %v1360_v19 = vpop.f32.mrf.mxu2 }
 0x4d4   : > { %v1361_v7 = vadd.f32 %v1360_v19, %v1322_v4 }
 0x4d6   : > { %v1366_v62 = vadd.f32 %v1592_v12, %v1361_v7 }
 0x4d8   : > { %1370 = vst [vmem:[%s352_s20 + $0x8] sm:$0xff] %v1366_v62 }
 0x4db   : > { %v1362_v56 = vpop.f32.mrf.mxu2 }
 0x4dc   : > { %v1363_v57 = vadd.f32 %v1362_v56, %v1327_v34 }
 0x4de   : > { %v1368_v44 = vadd.f32 %v1593_v42, %v1363_v57 }
 0x4e0   : > { %1372 = vst [vmem:[%s352_s20 + $0x18] sm:$0xff] %v1368_v44 }
 0x4e1   : > { %1621 = shalt.err (!%p1618_p3)
}
 0x4e2   : > { %s1677_s21 = smov 256   ;;  %s2645_s18 = smov 16  }
 0x4e3   : > { %1498 = dma.vmem_to_hbm [thread:$0]  (%p1771_p5), %s1387_s12, 512, %s1389_s25, %s1374_s11, %s1677_s21, %s1677_s21, %s2645_s18  }
 0x4e4 PF: > { %p1504_p4 = scmp.ge.s32.totalorder %s1656_s16, 2  ;;  %s1403_s20 = sand.u32 1, %s1644_s13  }
 0x4e5   : > { %s1404_s0 = scalar_lea.sflag [#allocation3], %s1403_s20 }
 0x4e6   : > { %p1501_p7 = pnand %p1504_p4, %p1775_p6 }
 0x4e8   : > { %p1502_p8 = pneg %p1501_p7 }
 0x4ea   : > { %1639 = dma.done.wait (%p1502_p8), %s1404_s0, 512  }
 0x4eb   : > { %1641 = vsyncadd (%p1502_p8), %s1404_s0, 4294966784  ;;  %p20_p9 = scmp.ge.s32.totalorder %s1758_s19, 4   ;;  %s2646_s13 = smov %s1648_s14 }
 0x4ec   : > { %s2647_s14 = smov %s1652_s15  ;;  %s2648_s15 = smov %s1769_s22 }
 0x4ed   : > { %s2649_s16 = smov %s1758_s19  ;;  %22 = sbr.rel (!%p20_p9) target bundleno = 5 (0x5), region = 102 }
 0x4f2   :  { %1410 = vsyncpa [#allocation3], 1 }
 0x4f3   :  { %1412 = vsyncpa [#allocation3 + $0x1], 1 }

</bundles_post_ra>
